<compile_context>
chip_gen: v7x
topology: tpu7x:2x2x1
jax: 0.10.0
libtpu: 0.0.40
codegen_flags: <defaults>
</compile_context>

<pallas_src>
import jax
import jax.numpy as jnp
from jax.experimental import pallas as pl
from jax.experimental.pallas import tpu as pltpu

C = 16           # GCNConv out_channels
HF = 8           # fc1 hidden size
P_DROP = 0.4
KEEP = 1.0 - P_DROP


def gcn_inference_kernel(gidx_ref,
                         xw1_ref, a_ref, dinv_ref, mask_ref,
                         b1_ref, w2_ref, b2_ref,
                         fc1w_ref, fc1b_ref, fc2w_ref, fc2b_ref,
                         out_ref):
    g, npg, c = xw1_ref.shape            # graphs per instance, nodes per graph, channels
    n = g * npg

    a = a_ref[...]                       # [G, npg, npg] bf16 binary (A + I) blocks
    dinv = dinv_ref[...]                 # [G, npg, 1]  f32  deg^{-1/2}

    # ---- conv1: D^{-1/2} (A+I) D^{-1/2} (x @ W1) + b1  (x @ W1 hoisted to wrapper)
    m1 = (xw1_ref[...] * dinv).astype(jnp.bfloat16)                 # src-side norm
    agg1 = jnp.einsum("gij,gjc->gic", a, m1,
                      preferred_element_type=jnp.float32)           # block-diag aggregation
    h1 = jnp.maximum(agg1 * dinv + b1_ref[...], 0.0)                # dst norm + bias + relu
    h1 = h1 * mask_ref[...]                                         # dropout (mask pre-scaled 1/keep)

    # ---- conv2 -> relu
    m2 = jnp.dot(h1.reshape(n, c).astype(jnp.bfloat16), w2_ref[...],
                 preferred_element_type=jnp.float32)                # [N, C]
    m2 = (m2.reshape(g, npg, c) * dinv).astype(jnp.bfloat16)
    agg2 = jnp.einsum("gij,gjc->gic", a, m2,
                      preferred_element_type=jnp.float32)
    h2 = jnp.maximum(agg2 * dinv + b2_ref[...], 0.0)                # [G, npg, C]

    # ---- per-graph gene-row select: same local row in every graph block.
    # Masked sublane reduce replaces the unrolled gather/concatenate loop.
    row_ids = jax.lax.broadcasted_iota(jnp.int32, (1, npg, 1), 1)
    sel = (row_ids == gidx_ref[0]).astype(jnp.float32)              # [1, npg, 1]
    tx = jnp.sum(h2 * sel, axis=1)                                  # [G, C]

    # ---- fc1 -> relu ; fc2 (8 -> 1) as VPU broadcast-mul + lane reduce
    t1 = jnp.maximum(
        jnp.dot(tx.astype(jnp.bfloat16), fc1w_ref[...],
                preferred_element_type=jnp.float32) + fc1b_ref[...], 0.0)   # [G, HF]
    # TODO(synk): emit a lane-dense [1, G] output row once G is in the hundreds.
    out_ref[...] = jnp.sum(t1 * fc2w_ref[...], axis=-1, keepdims=True) + fc2b_ref[...]


def gcn_inference(gene_idx, dropout_key, x, adj_blocks, dinv,
                  w1, b1, w2, b2, fc1w, fc1b, fc2w, fc2b):
    """Full forward pass.

    x:          [B, G, npg, d]    node features, B independent instances
    adj_blocks: [B, G, npg, npg]  bf16 binary (A + I) per-graph blocks
    dinv:       [B, G, npg, 1]    f32 deg^{-1/2}
    gene_idx:   [1] int32         local gene row within each graph block
    """
    B, G, NPG, _ = x.shape
    Cout = w1.shape[1]

    # Hoisted: x @ W1 (worst-shaped K=4 matmul) and the dropout mask
    # (in-kernel TPU PRNG has no interpret/CPU lowering).
    xw1 = jnp.einsum("bgnd,dc->bgnc", x, w1)                        # [B, G, npg, C] f32
    keep_mask = jax.random.bernoulli(dropout_key, KEEP, (B, G, NPG, Cout))
    drop_mask = keep_mask.astype(jnp.float32) * (1.0 / KEEP)        # values {0, 1/keep}

    def per_instance(tail):
        return pl.BlockSpec((None,) + tuple(tail),
                            lambda b, gidx: (b,) + (0,) * len(tail))

    def shared(shape):
        return pl.BlockSpec(tuple(shape), lambda b, gidx: (0,) * len(shape))

    grid_spec = pltpu.PrefetchScalarGridSpec(
        num_scalar_prefetch=1,
        grid=(B,),
        in_specs=[
            per_instance(xw1.shape[1:]),            # [G, npg, C]
            per_instance(adj_blocks.shape[1:]),     # [G, npg, npg]
            per_instance(dinv.shape[1:]),           # [G, npg, 1]
            per_instance(drop_mask.shape[1:]),      # [G, npg, C]
            shared(b1.shape), shared(w2.shape), shared(b2.shape),
            shared(fc1w.shape), shared(fc1b.shape),
            shared(fc2w.shape), shared(fc2b.shape),
        ],
        out_specs=pl.BlockSpec((None, G, 1), lambda b, gidx: (b, 0, 0)),
    )
    return pl.pallas_call(
        gcn_inference_kernel,
        out_shape=jax.ShapeDtypeStruct((B, G, 1), jnp.float32),
        grid_spec=grid_spec,
        compiler_params=pltpu.CompilerParams(
            dimension_semantics=("parallel",)),     # shard instances across v7x TCs
    )(gene_idx, xw1, adj_blocks, dinv, drop_mask,
      b1, w2.astype(jnp.bfloat16), b2,
      fc1w.astype(jnp.bfloat16), fc1b, fc2w, fc2b)


if __name__ == "__main__":
    key = jax.random.PRNGKey(0)
    (k_x, k_w1, k_b1, k_w2, k_b2,
     k_f1w, k_f1b, k_f2w, k_f2b, k_drop) = jax.random.split(key, 10)

    B = 4          # independent problem instances batched behind the grid
    G = 8          # graphs per instance (graph.num_graphs)
    NPG = 32       # nodes per graph
    D = 4          # input feature dim: GCNConv(d=4, 16)

    # deterministic per-graph topology: bidirectional ring + one chord
    src, dst = [], []
    for i in range(NPG):
        j = (i + 1) % NPG
        src += [i, j]
        dst += [j, i]
    src += [0, NPG // 2]
    dst += [NPG // 2, 0]
    a_block = (jnp.zeros((NPG, NPG), jnp.float32)
               .at[jnp.asarray(dst, jnp.int32), jnp.asarray(src, jnp.int32)].set(1.0)
               + jnp.eye(NPG, dtype=jnp.float32))                   # (A + I) for one graph
    deg = jnp.sum(a_block, axis=1, keepdims=True)                   # in-degree incl. self loop
    dinv_block = 1.0 / jnp.sqrt(deg)                                # [NPG, 1]

    adj_blocks = jnp.broadcast_to(a_block.astype(jnp.bfloat16), (B, G, NPG, NPG))
    dinv = jnp.broadcast_to(dinv_block, (B, G, NPG, 1))

    x = jax.random.normal(k_x, (B, G, NPG, D), jnp.float32)

    # --- parameters (deterministic init) ---
    w1 = jax.random.normal(k_w1, (D, C), jnp.float32) * 0.1
    b1 = jax.random.normal(k_b1, (1, C), jnp.float32) * 0.1
    w2 = jax.random.normal(k_w2, (C, C), jnp.float32) * 0.1
    b2 = jax.random.normal(k_b2, (1, C), jnp.float32) * 0.1
    fc1w = jax.random.normal(k_f1w, (C, HF), jnp.float32) * 0.1     # Linear(16, 8) W^T
    fc1b = jax.random.normal(k_f1b, (1, HF), jnp.float32) * 0.1
    fc2w = jax.random.normal(k_f2w, (1, HF), jnp.float32) * 0.1     # Linear(8, 1) weight row
    fc2b = jax.random.normal(k_f2b, (1, 1), jnp.float32) * 0.1

    gene_idx = jnp.asarray([5], jnp.int32)   # gene_idx_[0]: local row in each graph block

    fwd = jax.jit(gcn_inference)
    out = fwd(gene_idx, k_drop, x, adj_blocks, dinv,
              w1, b1, w2, b2, fc1w, fc1b, fc2w, fc2b)
    out = jax.block_until_ready(out)
    assert out.shape == (B, G, 1)
    print("KERNEL_OK")
</pallas_src>

<mosaic_0001>
module attributes {stable_mosaic.version = 11 : i64} {
  func.func @gcn_inference_kernel(%arg0: i32, %arg1: memref<1xi32, #tpu.memory_space<smem>>, %arg2: memref<1x8x32x16xf32, #tpu.memory_space<vmem>>, %arg3: memref<1x8x32x32xbf16, #tpu.memory_space<vmem>>, %arg4: memref<1x8x32x1xf32, #tpu.memory_space<vmem>>, %arg5: memref<1x8x32x16xf32, #tpu.memory_space<vmem>>, %arg6: memref<1x16xf32, #tpu.memory_space<vmem>>, %arg7: memref<16x16xbf16, #tpu.memory_space<vmem>>, %arg8: memref<1x16xf32, #tpu.memory_space<vmem>>, %arg9: memref<16x8xbf16, #tpu.memory_space<vmem>>, %arg10: memref<1x8xf32, #tpu.memory_space<vmem>>, %arg11: memref<1x8xf32, #tpu.memory_space<vmem>>, %arg12: memref<1x1xf32, #tpu.memory_space<vmem>>, %arg13: memref<1x8x1xf32, #tpu.memory_space<vmem>>) attributes {dimension_semantics = [#tpu.dimension_semantics<parallel>], iteration_bounds = array<i64: 4>, scalar_prefetch = 1 : i64, scratch_operands = 0 : i64, tpu.core_type = #tpu.core_type<tc>, window_params = [{transform_indices = @transform_0, window_bounds = array<i64: 1, 8, 32, 16>}, {transform_indices = @transform_1, window_bounds = array<i64: 1, 8, 32, 32>}, {transform_indices = @transform_2, window_bounds = array<i64: 1, 8, 32, 1>}, {transform_indices = @transform_3, window_bounds = array<i64: 1, 8, 32, 16>}, {pipeline_mode = #tpu.pipeline_mode<synchronous>, transform_indices = @transform_4, window_bounds = array<i64: 1, 16>}, {pipeline_mode = #tpu.pipeline_mode<synchronous>, transform_indices = @transform_5, window_bounds = array<i64: 16, 16>}, {pipeline_mode = #tpu.pipeline_mode<synchronous>, transform_indices = @transform_6, window_bounds = array<i64: 1, 16>}, {pipeline_mode = #tpu.pipeline_mode<synchronous>, transform_indices = @transform_7, window_bounds = array<i64: 16, 8>}, {pipeline_mode = #tpu.pipeline_mode<synchronous>, transform_indices = @transform_8, window_bounds = array<i64: 1, 8>}, {pipeline_mode = #tpu.pipeline_mode<synchronous>, transform_indices = @transform_9, window_bounds = array<i64: 1, 8>}, {pipeline_mode = #tpu.pipeline_mode<synchronous>, transform_indices = @transform_10, window_bounds = array<i64: 1, 1>}, {transform_indices = @transform_11, window_bounds = array<i64: 1, 8, 1>}]} {
    %c0 = arith.constant 0 : index
    %c0_0 = arith.constant 0 : index
    %c0_1 = arith.constant 0 : index
    %c0_2 = arith.constant 0 : index
    %0 = vector.load %arg3[%c0, %c0_0, %c0_1, %c0_2] : memref<1x8x32x32xbf16, #tpu.memory_space<vmem>>, vector<1x8x32x32xbf16>
    %1 = vector.shape_cast %0 : vector<1x8x32x32xbf16> to vector<8x32x32xbf16>
    %c0_3 = arith.constant 0 : index
    %c0_4 = arith.constant 0 : index
    %c0_5 = arith.constant 0 : index
    %c0_6 = arith.constant 0 : index
    %2 = vector.load %arg4[%c0_3, %c0_4, %c0_5, %c0_6] : memref<1x8x32x1xf32, #tpu.memory_space<vmem>>, vector<1x8x32x1xf32>
    %3 = vector.shape_cast %2 : vector<1x8x32x1xf32> to vector<8x32x1xf32>
    %c0_7 = arith.constant 0 : index
    %c0_8 = arith.constant 0 : index
    %c0_9 = arith.constant 0 : index
    %c0_10 = arith.constant 0 : index
    %4 = vector.load %arg2[%c0_7, %c0_8, %c0_9, %c0_10] : memref<1x8x32x16xf32, #tpu.memory_space<vmem>>, vector<1x8x32x16xf32>
    %5 = vector.shape_cast %4 : vector<1x8x32x16xf32> to vector<8x32x16xf32>
    %6 = vector.broadcast %3 : vector<8x32x1xf32> to vector<8x32x16xf32>
    %7 = arith.mulf %5, %6 : vector<8x32x16xf32>
    %8 = arith.truncf %7 : vector<8x32x16xf32> to vector<8x32x16xbf16>
    "tpu.trace_start"() <{level = 10 : i32, message = "gij,gjc->gic"}> : () -> ()
    %cst = arith.constant dense<0.000000e+00> : vector<8x32x16xf32>
    %9 = tpu.matmul %1, %8, %cst {dimension_numbers = #tpu.dot_dimension_numbers<[2], [1], [1], [2], [0, 0, 0, 1, 1, 2], [0], [0]>} : vector<8x32x32xbf16>, vector<8x32x16xbf16>, vector<8x32x16xf32> -> vector<8x32x16xf32>
    "tpu.trace_stop"() : () -> ()
    %10 = vector.broadcast %3 : vector<8x32x1xf32> to vector<8x32x16xf32>
    %11 = arith.mulf %9, %10 : vector<8x32x16xf32>
    %c0_11 = arith.constant 0 : index
    %c0_12 = arith.constant 0 : index
    %12 = vector.load %arg6[%c0_11, %c0_12] : memref<1x16xf32, #tpu.memory_space<vmem>>, vector<1x16xf32>
    %13 = vector.shape_cast %12 : vector<1x16xf32> to vector<1x1x16xf32>
    %14 = vector.broadcast %13 : vector<1x1x16xf32> to vector<8x32x16xf32>
    %15 = arith.addf %11, %14 : vector<8x32x16xf32>
    %cst_13 = arith.constant 0.000000e+00 : f32
    %16 = vector.broadcast %cst_13 : f32 to vector<8x32x16xf32>
    %17 = arith.maximumf %15, %16 : vector<8x32x16xf32>
    %c0_14 = arith.constant 0 : index
    %c0_15 = arith.constant 0 : index
    %c0_16 = arith.constant 0 : index
    %c0_17 = arith.constant 0 : index
    %18 = vector.load %arg5[%c0_14, %c0_15, %c0_16, %c0_17] : memref<1x8x32x16xf32, #tpu.memory_space<vmem>>, vector<1x8x32x16xf32>
    %19 = vector.shape_cast %18 : vector<1x8x32x16xf32> to vector<8x32x16xf32>
    %20 = arith.mulf %17, %19 : vector<8x32x16xf32>
    %21 = vector.shape_cast %20 : vector<8x32x16xf32> to vector<256x16xf32>
    %22 = arith.truncf %21 : vector<256x16xf32> to vector<256x16xbf16>
    %c0_18 = arith.constant 0 : index
    %c0_19 = arith.constant 0 : index
    %23 = vector.load %arg7[%c0_18, %c0_19] : memref<16x16xbf16, #tpu.memory_space<vmem>>, vector<16x16xbf16>
    %cst_20 = arith.constant dense<0.000000e+00> : vector<256x16xf32>
    %24 = tpu.matmul %22, %23, %cst_20 {dimension_numbers = #tpu.dot_dimension_numbers<[1], [0], [0], [1], [0, 0, 1, 1], [], []>} : vector<256x16xbf16>, vector<16x16xbf16>, vector<256x16xf32> -> vector<256x16xf32>
    %25 = vector.shape_cast %24 : vector<256x16xf32> to vector<8x32x16xf32>
    %26 = vector.broadcast %3 : vector<8x32x1xf32> to vector<8x32x16xf32>
    %27 = arith.mulf %25, %26 : vector<8x32x16xf32>
    %28 = arith.truncf %27 : vector<8x32x16xf32> to vector<8x32x16xbf16>
    "tpu.trace_start"() <{level = 10 : i32, message = "gij,gjc->gic"}> : () -> ()
    %cst_21 = arith.constant dense<0.000000e+00> : vector<8x32x16xf32>
    %29 = tpu.matmul %1, %28, %cst_21 {dimension_numbers = #tpu.dot_dimension_numbers<[2], [1], [1], [2], [0, 0, 0, 1, 1, 2], [0], [0]>} : vector<8x32x32xbf16>, vector<8x32x16xbf16>, vector<8x32x16xf32> -> vector<8x32x16xf32>
    "tpu.trace_stop"() : () -> ()
    %30 = vector.broadcast %3 : vector<8x32x1xf32> to vector<8x32x16xf32>
    %31 = arith.mulf %29, %30 : vector<8x32x16xf32>
    %c0_22 = arith.constant 0 : index
    %c0_23 = arith.constant 0 : index
    %32 = vector.load %arg8[%c0_22, %c0_23] : memref<1x16xf32, #tpu.memory_space<vmem>>, vector<1x16xf32>
    %33 = vector.shape_cast %32 : vector<1x16xf32> to vector<1x1x16xf32>
    %34 = vector.broadcast %33 : vector<1x1x16xf32> to vector<8x32x16xf32>
    %35 = arith.addf %31, %34 : vector<8x32x16xf32>
    %cst_24 = arith.constant 0.000000e+00 : f32
    %36 = vector.broadcast %cst_24 : f32 to vector<8x32x16xf32>
    %37 = arith.maximumf %35, %36 : vector<8x32x16xf32>
    %38 = tpu.iota {dimensions = array<i32: 1>} : vector<1x32x1xi32>
    %c0_25 = arith.constant 0 : index
    %39 = memref.load %arg1[%c0_25] : memref<1xi32, #tpu.memory_space<smem>>
    %40 = vector.broadcast %39 : i32 to vector<1x32x1xi32>
    %41 = arith.cmpi eq, %38, %40 : vector<1x32x1xi32>
    %42 = arith.extui %41 : vector<1x32x1xi1> to vector<1x32x1xi32>
    %43 = arith.sitofp %42 : vector<1x32x1xi32> to vector<1x32x1xf32>
    %44 = vector.broadcast %43 : vector<1x32x1xf32> to vector<8x32x16xf32>
    %45 = arith.mulf %37, %44 : vector<8x32x16xf32>
    %cst_26 = arith.constant dense<0.000000e+00> : vector<8x16xf32>
    %46 = vector.multi_reduction <add>, %45, %cst_26 [1] : vector<8x32x16xf32> to vector<8x16xf32>
    %47 = arith.truncf %46 : vector<8x16xf32> to vector<8x16xbf16>
    %c0_27 = arith.constant 0 : index
    %c0_28 = arith.constant 0 : index
    %48 = vector.load %arg9[%c0_27, %c0_28] : memref<16x8xbf16, #tpu.memory_space<vmem>>, vector<16x8xbf16>
    %cst_29 = arith.constant dense<0.000000e+00> : vector<8x8xf32>
    %49 = tpu.matmul %47, %48, %cst_29 {dimension_numbers = #tpu.dot_dimension_numbers<[1], [0], [0], [1], [0, 0, 1, 1], [], []>} : vector<8x16xbf16>, vector<16x8xbf16>, vector<8x8xf32> -> vector<8x8xf32>
    %c0_30 = arith.constant 0 : index
    %c0_31 = arith.constant 0 : index
    %50 = vector.load %arg10[%c0_30, %c0_31] : memref<1x8xf32, #tpu.memory_space<vmem>>, vector<1x8xf32>
    %51 = vector.broadcast %50 : vector<1x8xf32> to vector<8x8xf32>
    %52 = arith.addf %49, %51 : vector<8x8xf32>
    %cst_32 = arith.constant 0.000000e+00 : f32
    %53 = vector.broadcast %cst_32 : f32 to vector<8x8xf32>
    %54 = arith.maximumf %52, %53 : vector<8x8xf32>
    %c0_33 = arith.constant 0 : index
    %c0_34 = arith.constant 0 : index
    %55 = vector.load %arg11[%c0_33, %c0_34] : memref<1x8xf32, #tpu.memory_space<vmem>>, vector<1x8xf32>
    %56 = vector.broadcast %55 : vector<1x8xf32> to vector<8x8xf32>
    %57 = arith.mulf %54, %56 : vector<8x8xf32>
    %cst_35 = arith.constant dense<0.000000e+00> : vector<8xf32>
    %58 = vector.multi_reduction <add>, %57, %cst_35 [1] : vector<8x8xf32> to vector<8xf32>
    %59 = vector.shape_cast %58 : vector<8xf32> to vector<8x1xf32>
    %c0_36 = arith.constant 0 : index
    %c0_37 = arith.constant 0 : index
    %60 = vector.load %arg12[%c0_36, %c0_37] : memref<1x1xf32, #tpu.memory_space<vmem>>, vector<1x1xf32>
    %61 = vector.broadcast %60 : vector<1x1xf32> to vector<8x1xf32>
    %62 = arith.addf %59, %61 : vector<8x1xf32>
    %c0_38 = arith.constant 0 : index
    %c0_39 = arith.constant 0 : index
    %c0_40 = arith.constant 0 : index
    %63 = vector.load %arg13[%c0_38, %c0_39, %c0_40] : memref<1x8x1xf32, #tpu.memory_space<vmem>>, vector<1x8x1xf32>
    %64 = vector.shape_cast %63 : vector<1x8x1xf32> to vector<8x1xf32>
    %65 = vector.shape_cast %62 : vector<8x1xf32> to vector<1x8x1xf32>
    tpu.vector_store %arg13[%c0_38, %c0_39, %c0_40], %65 {strides = array<i32>} : memref<1x8x1xf32, #tpu.memory_space<vmem>>, vector<1x8x1xf32>,
    return
  }
  func.func @transform_0(%arg0: i32, %arg1: memref<1xi32, #tpu.memory_space<smem>>) -> (i32, i32, i32, i32) {
    %c0_i32 = arith.constant 0 : i32
    %c0_i32_0 = arith.constant 0 : i32
    %c0_i32_1 = arith.constant 0 : i32
    %c0_i32_2 = arith.constant 0 : i32
    return %arg0, %c0_i32, %c0_i32_0, %c0_i32_1 : i32, i32, i32, i32
  }
  func.func @transform_1(%arg0: i32, %arg1: memref<1xi32, #tpu.memory_space<smem>>) -> (i32, i32, i32, i32) {
    %c0_i32 = arith.constant 0 : i32
    %c0_i32_0 = arith.constant 0 : i32
    %c0_i32_1 = arith.constant 0 : i32
    %c0_i32_2 = arith.constant 0 : i32
    return %arg0, %c0_i32, %c0_i32_0, %c0_i32_1 : i32, i32, i32, i32
  }
  func.func @transform_2(%arg0: i32, %arg1: memref<1xi32, #tpu.memory_space<smem>>) -> (i32, i32, i32, i32) {
    %c0_i32 = arith.constant 0 : i32
    %c0_i32_0 = arith.constant 0 : i32
    %c0_i32_1 = arith.constant 0 : i32
    %c0_i32_2 = arith.constant 0 : i32
    return %arg0, %c0_i32, %c0_i32_0, %c0_i32_1 : i32, i32, i32, i32
  }
  func.func @transform_3(%arg0: i32, %arg1: memref<1xi32, #tpu.memory_space<smem>>) -> (i32, i32, i32, i32) {
    %c0_i32 = arith.constant 0 : i32
    %c0_i32_0 = arith.constant 0 : i32
    %c0_i32_1 = arith.constant 0 : i32
    %c0_i32_2 = arith.constant 0 : i32
    return %arg0, %c0_i32, %c0_i32_0, %c0_i32_1 : i32, i32, i32, i32
  }
  func.func @transform_4(%arg0: i32, %arg1: memref<1xi32, #tpu.memory_space<smem>>) -> (i32, i32) {
    %c0_i32 = arith.constant 0 : i32
    %c0_i32_0 = arith.constant 0 : i32
    %c0_i32_1 = arith.constant 0 : i32
    return %c0_i32, %c0_i32_0 : i32, i32
  }
  func.func @transform_5(%arg0: i32, %arg1: memref<1xi32, #tpu.memory_space<smem>>) -> (i32, i32) {
    %c0_i32 = arith.constant 0 : i32
    %c0_i32_0 = arith.constant 0 : i32
    %c0_i32_1 = arith.constant 0 : i32
    return %c0_i32, %c0_i32_0 : i32, i32
  }
  func.func @transform_6(%arg0: i32, %arg1: memref<1xi32, #tpu.memory_space<smem>>) -> (i32, i32) {
    %c0_i32 = arith.constant 0 : i32
    %c0_i32_0 = arith.constant 0 : i32
    %c0_i32_1 = arith.constant 0 : i32
    return %c0_i32, %c0_i32_0 : i32, i32
  }
  func.func @transform_7(%arg0: i32, %arg1: memref<1xi32, #tpu.memory_space<smem>>) -> (i32, i32) {
    %c0_i32 = arith.constant 0 : i32
    %c0_i32_0 = arith.constant 0 : i32
    %c0_i32_1 = arith.constant 0 : i32
    return %c0_i32, %c0_i32_0 : i32, i32
  }
  func.func @transform_8(%arg0: i32, %arg1: memref<1xi32, #tpu.memory_space<smem>>) -> (i32, i32) {
    %c0_i32 = arith.constant 0 : i32
    %c0_i32_0 = arith.constant 0 : i32
    %c0_i32_1 = arith.constant 0 : i32
    return %c0_i32, %c0_i32_0 : i32, i32
  }
  func.func @transform_9(%arg0: i32, %arg1: memref<1xi32, #tpu.memory_space<smem>>) -> (i32, i32) {
    %c0_i32 = arith.constant 0 : i32
    %c0_i32_0 = arith.constant 0 : i32
    %c0_i32_1 = arith.constant 0 : i32
    return %c0_i32, %c0_i32_0 : i32, i32
  }
  func.func @transform_10(%arg0: i32, %arg1: memref<1xi32, #tpu.memory_space<smem>>) -> (i32, i32) {
    %c0_i32 = arith.constant 0 : i32
    %c0_i32_0 = arith.constant 0 : i32
    %c0_i32_1 = arith.constant 0 : i32
    return %c0_i32, %c0_i32_0 : i32, i32
  }
  func.func @transform_11(%arg0: i32, %arg1: memref<1xi32, #tpu.memory_space<smem>>) -> (i32, i32, i32) {
    %c0_i32 = arith.constant 0 : i32
    %c0_i32_0 = arith.constant 0 : i32
    %c0_i32_1 = arith.constant 0 : i32
    return %arg0, %c0_i32, %c0_i32_0 : i32, i32, i32
  }
}

</mosaic_0001>

<bundles_post_ra>
// kernel: gcn_inference.1
= control target key start
LH: loop header
LB: loop body
LE: loop exit
PB: predicated region body
PF: predicated region fallthrough
CT: control target
= control target key end

     0   :  { %s3043_s25 = smov 0   ;;  %s3666_s0 = inlined_call_operand.<no memory space> [shape: s32[1], index: 0, kind: input, shape index: {}]   ;;  %s3667_s1 = inlined_call_operand.vmem [shape: f32[4,8,32,16], index: 1, kind: input, shape index: {}]   ;;  %s3668_s2 = inlined_call_operand.vmem [shape: bf16[4,8,32,32], index: 2, kind: input, shape index: {}]   ;;  %s3669_s3 = inlined_call_operand.vmem [shape: f32[4,8,32,1], index: 3, kind: input, shape index: {}]   ;;  %s3670_s4 = inlined_call_operand.vmem [shape: f32[4,8,32,16], index: 4, kind: input, shape index: {}]   ;;  %s3671_s5 = inlined_call_operand.vmem [shape: f32[1,16], index: 5, kind: input, shape index: {}]   ;;  %s3672_s6 = inlined_call_operand.vmem [shape: bf16[16,16], index: 6, kind: input, shape index: {}]   ;;  %s3673_s7 = inlined_call_operand.vmem [shape: f32[1,16], index: 7, kind: input, shape index: {}]   ;;  %s3674_s8 = inlined_call_operand.vmem [shape: bf16[16,8], index: 8, kind: input, shape index: {}]   ;;  %s3675_s9 = inlined_call_operand.vmem [shape: f32[1,8], index: 9, kind: input, shape index: {}]   ;;  %s3676_s10 = inlined_call_operand.vmem [shape: f32[1,8], index: 10, kind: input, shape index: {}]   ;;  %s3677_s11 = inlined_call_operand.<no memory space> [shape: f32[1,1], index: 11, kind: input, shape index: {}]   ;;  %s3678_s12 = inlined_call_operand.vmem [shape: f32[4,8,1], index: 12, kind: output, shape index: {}]  }
   0x1   :  { %17 = sst [smem:[#allocation3]] %s3666_s0  ;;  %v18_v0 = vstv %s3677_s11 }
   0x2   :  { %19 = vst [vmem:[#allocation4] sm:$0x1] %v18_v0 }
   0x3 LB: > { %s2583_s26 = sadd.s32 4294967295, %s2967_s25   ;;  %p2587_p0 = scmp.ge.s32.totalorder %s2967_s25, 1  ;;  %s2967_s25 = sphi %s3043_s25, %s25_s25  }
   0x4   : > { %p371_p1 = scmp.lt.s32.totalorder %s2967_s25, 5 }
   0x6   : > { %p372_p2 = pnand %p2587_p0, %p371_p1 }
   0x8   : > { %375 = sbr.rel (%p372_p2) target bundleno = 1288 (0x508), region = 64 }
   0xf   : > { %p425_p3 = scmp.lt.s32.totalorder %s2583_s26, 3  ;;  %v2969_v1 = vmov 0   ;;  %vm764_vm0 = vcmask 261120   ;;  %vm1466_vm1 = vcmask 130048   ;;  %vm2971_vm2 = vmmov 0   ;;  %s2224_s27 = sld [smem:[#allocation3]] }
  0x10   : > { %2942 = vset.pattern.permute.xlu1 %v2969_v1  ;;  %2941 = vset.pattern.permute.xlu0 %v2969_v1  ;;  %vm2407_vm7 = vcmask 1041409   ;;  %vm2409_vm8 = vcmask 1042434   ;;  %vm2411_vm9 = vcmask 1043459   ;;  %vm2413_vm10 = vcmask 1044484  }
  0x11   : > { %s3713_s26 = smov (!%p425_p3, %s2583_s26), 3  ;;  %vm2415_vm11 = vcmask 1045509   ;;  %vm2417_vm12 = vcmask 1046534   ;;  %vm2419_vm13 = vcmask 1047559   ;;  %vm2480_vm14 = vcmask 64512  }
  0x12   : > { %s3054_s0 = sshll.u32 %s3713_s26, 8  ;;  %s2676_s29 = sshll.u32 %s3713_s26, 7  ;;  %vm2492_vm15 = vcmask 7168  }
  0x13   : > { %s3060_s28 = scalar_lea.vmem %s3669_s3, %s3054_s0  ;;  %s3076_s14 = scalar_lea.vmem %s3668_s2, %s2676_s29 }
  0x14   : > { %v484_v2 = vld [vmem:[%s3060_s28 + $0x10] sm:$0xff]  ;;  %v482_v3 = vld [vmem:[%s3060_s28] sm:$0xff]  ;;  %v485_v4 = vld [vmem:[%s3060_s28 + $0x18] sm:$0xff]  ;;  %s3114_s17 = scalar_lea.vmem %s3667_s1, %s3054_s0  ;;  %s3328_s24 = scalar_lea.vmem %s3670_s4, %s3054_s0 }
  0x15   : > { %558 = vperm.xlu1 %2942, %v484_v2   ;;  %548 = vperm.xlu0 %2941, %v482_v3   ;;  %v483_v5 = vld [vmem:[%s3060_s28 + $0x8] sm:$0xff]  ;;  %v486_v7 = vld [vmem:[%s3060_s28 + $0x20] sm:$0xff]  ;;  %v489_v8 = vld [vmem:[%s3060_s28 + $0x38] sm:$0xff]  ;;  %s2596_s16 = sshll.u32 %s3713_s26, 3 }
  0x16   : > { %v487_v6 = vld [vmem:[%s3060_s28 + $0x28] sm:$0xff]  ;;  %v488_v9 = vld [vmem:[%s3060_s28 + $0x30] sm:$0xff]  ;;  %v490_v11 = vld [vmem:[%s3060_s28 + $0x40] sm:$0xff]  ;;  %s448_s19 = scalar_lea.vmem %s3678_s12, %s2596_s16 }
  0x17   : > { %v491_v10 = vld [vmem:[%s3060_s28 + $0x48] sm:$0xff]  ;;  %v3079_v12 = vld [vmem:[%s3076_s14] sm:$0xff]   ;;  %v493_v13 = vld [vmem:[%s3060_s28 + $0x58] sm:$0xff] }
  0x18   : > { %v492_v14 = vld [vmem:[%s3060_s28 + $0x50] sm:$0xff]  ;;  %2766 = vmatprep.mubr.msk.bf16.mxu0 %vm764_vm0, %v3079_v12  ;;  %v495_v16 = vld [vmem:[%s3060_s28 + $0x68] sm:$0xff]  ;;  %v494_v17 = vld [vmem:[%s3060_s28 + $0x60] sm:$0xff] }
  0x19   : > { %563 = vperm.xlu1 %2942, %v485_v4   ;;  %553 = vperm.xlu0 %2941, %v483_v5   ;;  %v3086_v15 = vld [vmem:[%s3076_s14 + $0x10] sm:$0xff]   ;;  %v497_v18 = vld [vmem:[%s3060_s28 + $0x78] sm:$0xff]  ;;  %v499_v20 = vld [vmem:[%s3060_s28 + $0x88] sm:$0xff] }
  0x1a   : > { %2774 = vmatprep.mubr.msk.bf16.mxu1 %vm764_vm0, %v3086_v15  ;;  %v496_v19 = vld [vmem:[%s3060_s28 + $0x70] sm:$0xff]  ;;  %v498_v21 = vld [vmem:[%s3060_s28 + $0x80] sm:$0xff]  ;;  %v501_v22 = vld [vmem:[%s3060_s28 + $0x98] sm:$0xff] }
  0x1b   : > { %v500_v23 = vld [vmem:[%s3060_s28 + $0x90] sm:$0xff]  ;;  %v503_v24 = vld [vmem:[%s3060_s28 + $0xa8] sm:$0xff]  ;;  %v502_v25 = vld [vmem:[%s3060_s28 + $0xa0] sm:$0xff] }
  0x1c   : > { %v505_v26 = vld [vmem:[%s3060_s28 + $0xb8] sm:$0xff]  ;;  %v504_v27 = vld [vmem:[%s3060_s28 + $0xb0] sm:$0xff]  ;;  %v507_v28 = vld [vmem:[%s3060_s28 + $0xc8] sm:$0xff] }
  0x1d   : > { %573 = vperm.xlu1 %2942, %v487_v6   ;;  %568 = vperm.xlu0 %2941, %v486_v7   ;;  %v506_v29 = vld [vmem:[%s3060_s28 + $0xc0] sm:$0xff]  ;;  %v509_v30 = vld [vmem:[%s3060_s28 + $0xd8] sm:$0xff]  ;;  %v508_v31 = vld [vmem:[%s3060_s28 + $0xd0] sm:$0xff] }
  0x1e   : > { %v511_v32 = vld [vmem:[%s3060_s28 + $0xe8] sm:$0xff]  ;;  %v510_v33 = vld [vmem:[%s3060_s28 + $0xe0] sm:$0xff]  ;;  %v513_v34 = vld [vmem:[%s3060_s28 + $0xf8] sm:$0xff] }
  0x1f   : > { %v512_v35 = vld [vmem:[%s3060_s28 + $0xf0] sm:$0xff]  ;;  %v517_v39 = vld [vmem:[%s3114_s17 + $0x18] sm:$0xff]  ;;  %v514_v40 = vld [vmem:[%s3114_s17] sm:$0xff] }
  0x20   : > { %v516_v38 = vld [vmem:[%s3114_s17 + $0x10] sm:$0xff]  ;;  %v515_v41 = vld [vmem:[%s3114_s17 + $0x8] sm:$0xff]  ;;  %v518_v48 = vld [vmem:[%s3114_s17 + $0x20] sm:$0xff] }
  0x21   : > { %583 = vperm.xlu1 %2942, %v489_v8   ;;  %578 = vperm.xlu0 %2941, %v488_v9   ;;  %v519_v49 = vld [vmem:[%s3114_s17 + $0x28] sm:$0xff]  ;;  %v521_v56 = vld [vmem:[%s3114_s17 + $0x38] sm:$0xff]  ;;  %v520_v57 = vld [vmem:[%s3114_s17 + $0x30] sm:$0xff] }
  0x22   : > { %v3149_v63 = vld [vmem:[%s3076_s14 + $0x8] sm:$0xff]   ;;  %v522_v1 = vld [vmem:[%s3114_s17 + $0x40] sm:$0xff]  ;;  %v3165_v8 = vld [vmem:[%s3076_s14 + $0x18] sm:$0xff]  }
  0x23   : > { %v523_v0 = vld [vmem:[%s3114_s17 + $0x48] sm:$0xff]  ;;  %v3154_v2 = vld [vmem:[%s3076_s14 + $0x20] sm:$0xff]   ;;  %v525_v9 = vld [vmem:[%s3114_s17 + $0x58] sm:$0xff] }
  0x25   : > { %593 = vperm.xlu1 %2942, %v491_v10   ;;  %588 = vperm.xlu0 %2941, %v490_v11   ;;  %v524_v10 = vld [vmem:[%s3114_s17 + $0x50] sm:$0xff] }
  0x26   : > { %v3172_v11 = vld [vmem:[%s3076_s14 + $0x30] sm:$0xff]  }
  0x27   : > { %3690 = vst [vmem:[#allocation5_spill] sm:$0xff] %v3172_v11 }
  0x29   : > { %603 = vperm.xlu1 %2942, %v493_v13   ;;  %598 = vperm.xlu0 %2941, %v492_v14  }
  0x2d   : > { %613 = vperm.xlu1 %2942, %v495_v16   ;;  %608 = vperm.xlu0 %2941, %v494_v17  }
  0x31   : > { %623 = vperm.xlu1 %2942, %v497_v18   ;;  %618 = vperm.xlu0 %2941, %v496_v19   ;;  %v527_v19 = vld [vmem:[%s3114_s17 + $0x68] sm:$0xff] }
  0x35   : > { %633 = vperm.xlu1 %2942, %v499_v20   ;;  %628 = vperm.xlu0 %2941, %v498_v21   ;;  %v526_v20 = vld [vmem:[%s3114_s17 + $0x60] sm:$0xff] }
  0x39   : > { %643 = vperm.xlu1 %2942, %v501_v22   ;;  %638 = vperm.xlu0 %2941, %v500_v23  }
  0x3d   : > { %653 = vperm.xlu1 %2942, %v503_v24   ;;  %648 = vperm.xlu0 %2941, %v502_v25  }
  0x41   : > { %663 = vperm.xlu1 %2942, %v505_v26   ;;  %658 = vperm.xlu0 %2941, %v504_v27   ;;  %v3193_v26 = vld [vmem:[%s3076_s14 + $0x28] sm:$0xff]   ;;  %v529_v27 = vld [vmem:[%s3114_s17 + $0x78] sm:$0xff] }
  0x42   : > { %3691 = vst [vmem:[#allocation6_spill] sm:$0xff] %v3193_v26 }
  0x45   : > { %673 = vperm.xlu1 %2942, %v507_v28   ;;  %668 = vperm.xlu0 %2941, %v506_v29   ;;  %v528_v28 = vld [vmem:[%s3114_s17 + $0x70] sm:$0xff]  ;;  %v3198_v29 = vld [vmem:[%s3076_s14 + $0x40] sm:$0xff]  }
  0x46   : > { %3692 = vst [vmem:[#allocation7_spill] sm:$0xff] %v3198_v29 }
  0x49   : > { %683 = vperm.xlu1 %2942, %v509_v30   ;;  %678 = vperm.xlu0 %2941, %v508_v31  }
  0x4d   : > { %693 = vperm.xlu1 %2942, %v511_v32   ;;  %688 = vperm.xlu0 %2941, %v510_v33  }
  0x51   : > { %703 = vperm.xlu1 %2942, %v513_v34   ;;  %698 = vperm.xlu0 %2941, %v512_v35   ;;  %v531_v35 = vld [vmem:[%s3114_s17 + $0x88] sm:$0xff] }
  0x94   : > { %v3116_v36 = vpop.permute.xlu1 %558  ;;  %v3118_v37 = vpop.permute.xlu0 %548 }
  0x95   : > { %v708_v44 = vmul.f32 %v3116_v36, %v516_v38  ;;  %v706_v46 = vmul.f32 %v3118_v37, %v514_v40  ;;  %v530_v38 = vld [vmem:[%s3114_s17 + $0x80] sm:$0xff] }
  0x98   : > { %v3124_v42 = vpop.permute.xlu1 %563  ;;  %v3126_v43 = vpop.permute.xlu0 %553 }
  0x99   : > { %v709_v45 = vmul.f32 %v3124_v42, %v517_v39  ;;  %v707_v47 = vmul.f32 %v3126_v43, %v515_v41 }
  0x9b   : > { %v738_v50 = vpack.c.bf16 %v707_v47, %v706_v46  ;;  %v739_v53 = vpack.c.bf16 %v709_v45, %v708_v44  ;;  %v3219_v46 = vld [vmem:[%s3076_s14 + $0x38] sm:$0xff]  }
  0x9c   : > { %v3134_v51 = vpop.permute.xlu1 %573  ;;  %v3136_v52 = vpop.permute.xlu0 %568  ;;  %3693 = vst [vmem:[#allocation8_spill] sm:$0xff] %v3219_v46  ;;  %v533_v47 = vld [vmem:[%s3114_s17 + $0x98] sm:$0xff] }
  0x9d   : > { %2762 = vmatprep.subr.bf16.mxu0 %v738_v50  ;;  %v710_v54 = vmul.f32 %v3136_v52, %v518_v48  ;;  %v711_v55 = vmul.f32 %v3134_v51, %v519_v49  ;;  %v532_v48 = vld [vmem:[%s3114_s17 + $0x90] sm:$0xff] }
  0x9e   : > { %2763 = vmatpush3.bf16.msra.mxu0 %v738_v50  ;;  %v3224_v49 = vld [vmem:[%s3076_s14 + $0x50] sm:$0xff]  }
  0x9f   : > { %2764 = vmatprep.subr.bf16.mxu0 %v739_v53  ;;  %v740_v58 = vpack.c.bf16 %v711_v55, %v710_v54  ;;  %3694 = vst [vmem:[#allocation9_spill] sm:$0xff] %v3224_v49 }
  0xa0   : > { %v3142_v59 = vpop.permute.xlu1 %583  ;;  %v3144_v60 = vpop.permute.xlu0 %578 }
  0xa1   : > { %v713_v61 = vmul.f32 %v3142_v59, %v521_v56  ;;  %v712_v62 = vmul.f32 %v3144_v60, %v520_v57  ;;  %2770 = vmatprep.subr.bf16.mxu1 %v740_v58  ;;  %v535_v57 = vld [vmem:[%s3114_s17 + $0xa8] sm:$0xff] }
  0xa2   : > { %2765 = vmatpush3.bf16.msra.mxu0 %v739_v53  ;;  %2771 = vmatpush3.bf16.msra.mxu1 %v740_v58  ;;  %v534_v58 = vld [vmem:[%s3114_s17 + $0xa0] sm:$0xff] }
  0xa3   : > { %v741_v3 = vpack.c.bf16 %v713_v61, %v712_v62 }
  0xa4   : > { %v3156_v4 = vpop.permute.xlu1 %593  ;;  %v3158_v5 = vpop.permute.xlu0 %588 }
  0xa5   : > { %v715_v6 = vmul.f32 %v3156_v4, %v523_v0  ;;  %v714_v7 = vmul.f32 %v3158_v5, %v522_v1  ;;  %2767 = vmatmul.mubr.msk.bf16.vlgmr.msra.gmra.mrb[0].mxu0 %vm764_vm0, %v3149_v63  ;;  %2772 = vmatprep.subr.bf16.mxu1 %v741_v3 }
  0xa6   : > { %2773 = vmatpush3.bf16.msra.mxu1 %v741_v3  ;;  %2782 = vmatprep.mubr.msk.bf16.mxu0 %vm764_vm0, %v3154_v2 }
  0xa7   : > { %v742_v13 = vpack.c.bf16 %v715_v6, %v714_v7  ;;  %v3245_v6 = vld [vmem:[%s3076_s14 + $0x48] sm:$0xff]   ;;  %v537_v7 = vld [vmem:[%s3114_s17 + $0xb8] sm:$0xff] }
  0xa8   : > { %v3174_v14 = vpop.permute.xlu1 %603  ;;  %v3176_v16 = vpop.permute.xlu0 %598  ;;  %3695 = vst [vmem:[#allocation10_spill] sm:$0xff] %v3245_v6 }
  0xa9   : > { %v717_v17 = vmul.f32 %v3174_v14, %v525_v9  ;;  %v716_v18 = vmul.f32 %v3176_v16, %v524_v10  ;;  %2775 = vmatmul.mubr.msk.bf16.vlgmr.msra.gmra.mrb[0].mxu1 %vm764_vm0, %v3165_v8  ;;  %2778 = vmatprep.subr.bf16.mxu0 %v742_v13  ;;  %v536_v9 = vld [vmem:[%s3114_s17 + $0xb0] sm:$0xff]  ;;  %v3250_v10 = vld [vmem:[%s3076_s14 + $0x60] sm:$0xff]  }
  0xaa   : > { %2779 = vmatpush3.bf16.msra.mxu0 %v742_v13  ;;  %2790 = vmatprep.mubr.msk.bf16.mxu1 %vm764_vm0, %v3172_v11  ;;  %3696 = vst [vmem:[#allocation11_spill] sm:$0xff] %v3250_v10 }
  0xab   : > { %v743_v21 = vpack.c.bf16 %v717_v17, %v716_v18 }
  0xac   : > { %v3186_v22 = vpop.permute.xlu1 %613  ;;  %v3188_v23 = vpop.permute.xlu0 %608 }
  0xad   : > { %v719_v24 = vmul.f32 %v3186_v22, %v527_v19  ;;  %v718_v25 = vmul.f32 %v3188_v23, %v526_v20  ;;  %2780 = vmatprep.subr.bf16.mxu0 %v743_v21 }
  0xae   : > { %2781 = vmatpush3.bf16.msra.mxu0 %v743_v21  ;;  %v539_v21 = vld [vmem:[%s3114_s17 + $0xc8] sm:$0xff] }
  0xaf   : > { %v744_v30 = vpack.c.bf16 %v719_v24, %v718_v25  ;;  %v538_v24 = vld [vmem:[%s3114_s17 + $0xc0] sm:$0xff] }
  0xb0   : > { %v3200_v31 = vpop.permute.xlu1 %623  ;;  %v3202_v32 = vpop.permute.xlu0 %618 }
  0xb1   : > { %v721_v33 = vmul.f32 %v3200_v31, %v529_v27  ;;  %v720_v34 = vmul.f32 %v3202_v32, %v528_v28  ;;  %2783 = vmatmul.mubr.msk.bf16.vlgmr.msra.gmra.mrb[4].mxu0 %vm764_vm0, %v3193_v26  ;;  %2786 = vmatprep.subr.bf16.mxu1 %v744_v30 }
  0xb2   : > { %2787 = vmatpush3.bf16.msra.mxu1 %v744_v30  ;;  %2798 = vmatprep.mubr.msk.bf16.mxu0 %vm764_vm0, %v3198_v29  ;;  %v1382_v29 = vld [vmem:[%s3328_s24 + $0x20] sm:$0xff] }
  0xb3   : > { %v745_v39 = vpack.c.bf16 %v721_v33, %v720_v34  ;;  %v3271_v34 = vld [vmem:[%s3076_s14 + $0x58] sm:$0xff]  }
  0xb4   : > { %v3212_v40 = vpop.permute.xlu1 %633  ;;  %v3214_v41 = vpop.permute.xlu0 %628  ;;  %3697 = vst [vmem:[#allocation12_spill] sm:$0xff] %v3271_v34 }
  0xb5   : > { %v723_v44 = vmul.f32 %v3212_v40, %v531_v35  ;;  %v722_v45 = vmul.f32 %v3214_v41, %v530_v38  ;;  %2788 = vmatprep.subr.bf16.mxu1 %v745_v39  ;;  %v541_v35 = vld [vmem:[%s3114_s17 + $0xd8] sm:$0xff]  ;;  %v540_v38 = vld [vmem:[%s3114_s17 + $0xd0] sm:$0xff] }
  0xb6   : > { %2789 = vmatpush3.bf16.msra.mxu1 %v745_v39  ;;  %v3276_v39 = vld [vmem:[%s3076_s14 + $0x70] sm:$0xff]  }
  0xb7   : > { %v746_v50 = vpack.c.bf16 %v723_v44, %v722_v45  ;;  %3698 = vst [vmem:[#allocation13_spill] sm:$0xff] %v3276_v39 }
  0xb8   : > { %v3226_v53 = vpop.permute.xlu1 %643  ;;  %v3228_v54 = vpop.permute.xlu0 %638 }
  0xb9   : > { %v725_v55 = vmul.f32 %v3226_v53, %v533_v47  ;;  %v724_v56 = vmul.f32 %v3228_v54, %v532_v48  ;;  %2791 = vmatmul.mubr.msk.bf16.vlgmr.msra.gmra.mrb[4].mxu1 %vm764_vm0, %v3219_v46  ;;  %2794 = vmatprep.subr.bf16.mxu0 %v746_v50  ;;  %v1385_v46 = vld [vmem:[%s3328_s24 + $0x38] sm:$0xff] }
  0xba   : > { %2795 = vmatpush3.bf16.msra.mxu0 %v746_v50  ;;  %2806 = vmatprep.mubr.msk.bf16.mxu1 %vm764_vm0, %v3224_v49 }
  0xbb   : > { %v747_v61 = vpack.c.bf16 %v725_v55, %v724_v56  ;;  %v543_v55 = vld [vmem:[%s3114_s17 + $0xe8] sm:$0xff]  ;;  %v542_v56 = vld [vmem:[%s3114_s17 + $0xe0] sm:$0xff] }
  0xbc   : > { %v3238_v62 = vpop.permute.xlu1 %653  ;;  %v3240_v0 = vpop.permute.xlu0 %648 }
  0xbd   : > { %v727_v1 = vmul.f32 %v3238_v62, %v535_v57  ;;  %v726_v3 = vmul.f32 %v3240_v0, %v534_v58  ;;  %2796 = vmatprep.subr.bf16.mxu0 %v747_v61 }
  0xbe   : > { %2797 = vmatpush3.bf16.msra.mxu0 %v747_v61 }
  0xbf   : > { %v748_v13 = vpack.c.bf16 %v727_v1, %v726_v3 }
  0xc0   : > { %v3252_v17 = vpop.permute.xlu1 %663  ;;  %v3254_v18 = vpop.permute.xlu0 %658 }
  0xc1   : > { %v729_v19 = vmul.f32 %v3252_v17, %v537_v7  ;;  %v728_v20 = vmul.f32 %v3254_v18, %v536_v9  ;;  %2799 = vmatmul.mubr.msk.bf16.vlgmr.msra.gmra.mrb[8].mxu0 %vm764_vm0, %v3245_v6  ;;  %2802 = vmatprep.subr.bf16.mxu1 %v748_v13  ;;  %v3297_v7 = vld [vmem:[%s3076_s14 + $0x68] sm:$0xff]   ;;  %v545_v9 = vld [vmem:[%s3114_s17 + $0xf8] sm:$0xff] }
  0xc2   : > { %2803 = vmatpush3.bf16.msra.mxu1 %v748_v13  ;;  %2814 = vmatprep.mubr.msk.bf16.mxu0 %vm764_vm0, %v3250_v10  ;;  %3699 = vst [vmem:[#allocation14_spill] sm:$0xff] %v3297_v7  ;;  %v544_v13 = vld [vmem:[%s3114_s17 + $0xf0] sm:$0xff] }
  0xc3   : > { %v749_v25 = vpack.c.bf16 %v729_v19, %v728_v20 }
  0xc4   : > { %v3264_v27 = vpop.permute.xlu1 %673  ;;  %v3266_v28 = vpop.permute.xlu0 %668 }
  0xc5   : > { %v731_v30 = vmul.f32 %v3264_v27, %v539_v21  ;;  %v730_v33 = vmul.f32 %v3266_v28, %v538_v24  ;;  %2804 = vmatprep.subr.bf16.mxu1 %v749_v25 }
  0xc6   : > { %2805 = vmatpush3.bf16.msra.mxu1 %v749_v25 }
  0xc7   : > { %v750_v44 = vpack.c.bf16 %v731_v30, %v730_v33  ;;  %v3310_v33 = vld [vmem:[%s3076_s14 + $0x78] sm:$0xff]  }
  0xc8   : > { %v3278_v45 = vpop.permute.xlu1 %683  ;;  %v3280_v47 = vpop.permute.xlu0 %678  ;;  %3700 = vst [vmem:[#allocation15_spill] sm:$0xff] %v3310_v33 }
  0xc9   : > { %v733_v48 = vmul.f32 %v3278_v45, %v541_v35  ;;  %v732_v50 = vmul.f32 %v3280_v47, %v540_v38  ;;  %2807 = vmatmul.mubr.msk.bf16.vlgmr.msra.gmra.mrb[8].mxu1 %vm764_vm0, %v3271_v34  ;;  %2810 = vmatprep.subr.bf16.mxu0 %v750_v44  ;;  %v2959_v35 = vld [vmem:[%s3672_s6] sm:$0xff]  }
  0xca   : > { %2811 = vmatpush3.bf16.msra.mxu0 %v750_v44  ;;  %2822 = vmatprep.mubr.msk.bf16.mxu1 %vm764_vm0, %v3276_v39  ;;  %v3322_v44 = vld [vmem:[%s3671_s5] ss:$0 sm:$0xff] }
  0xcb   : > { %v751_v57 = vpack.c.bf16 %v733_v48, %v732_v50 }
  0xcc   : > { %v3290_v58 = vpop.permute.xlu1 %693  ;;  %v3292_v61 = vpop.permute.xlu0 %688 }
  0xcd   : > { %v735_v1 = vmul.f32 %v3290_v58, %v543_v55  ;;  %v734_v3 = vmul.f32 %v3292_v61, %v542_v56  ;;  %2812 = vmatprep.subr.bf16.mxu0 %v751_v57 }
  0xce   : > { %2813 = vmatpush3.bf16.msra.mxu0 %v751_v57 }
  0xcf   : > { %v752_v19 = vpack.c.bf16 %v735_v1, %v734_v3  ;;  %2826 = vmatprep.subr.bf16.mxu0 %v2959_v35  ;;  %v1380_v3 = vld [vmem:[%s3328_s24 + $0x10] sm:$0xff] }
  0xd0   : > { %v3301_v20 = vpop.permute.xlu1 %703  ;;  %v3303_v21 = vpop.permute.xlu0 %698 }
  0xd1   : > { %v737_v24 = vmul.f32 %v3301_v20, %v545_v9  ;;  %v736_v25 = vmul.f32 %v3303_v21, %v544_v13  ;;  %2815 = vmatmul.mubr.msk.bf16.vlgmr.msra.gmra.mrb[12].mxu0 %vm764_vm0, %v3297_v7  ;;  %2818 = vmatprep.subr.bf16.mxu1 %v752_v19 }
  0xd2   : > { %2819 = vmatpush3.bf16.msra.mxu1 %v752_v19  ;;  %2827 = vmatpush3.bf16.msra.mxu0 %v2959_v35 }
  0xd3   : > { %v753_v30 = vpack.c.bf16 %v737_v24, %v736_v25  ;;  %v1378_v25 = vld [vmem:[%s3328_s24] sm:$0xff] }
  0xd5   : > { %2820 = vmatprep.subr.bf16.mxu1 %v753_v30 }
  0xd6   : > { %2821 = vmatpush3.bf16.msra.mxu1 %v753_v30 }
  0xd9   : > { %2823 = vmatmul.mubr.msk.bf16.vlgmr.msra.gmra.mrb[12].mxu1 %vm764_vm0, %v3310_v33 }
  0xda   : > { %2864 = vmatprep.mubr.msk.bf16.mxu1 %vm764_vm0, %v3079_v12 }
 0x178   : > { %v2768_v38 = vpop.f32.mrb[0].mxu0 }
 0x179   : > { %v1277_v12 = vmul.f32 %v2768_v38, %v3116_v36  ;;  %v805_v48 = vpop.f32.mrb[1].mxu0 }
 0x17a   : > { %v1275_v50 = vmul.f32 %v805_v48, %v3118_v37  ;;  %v2769_v55 = vpop.f32.mrb[2].mxu0 }
 0x17b   : > { %v1316_v56 = vadd.f32 %v3322_v44, %v1277_v12  ;;  %v1278_v57 = vmul.f32 %v2769_v55, %v3124_v42  ;;  %v808_v1 = vpop.f32.mrb[3].mxu0  ;;  %v1381_v12 = vld [vmem:[%s3328_s24 + $0x18] sm:$0xff] }
 0x17c   : > { %v1314_v9 = vadd.f32 %v3322_v44, %v1275_v50  ;;  %v1276_v13 = vmul.f32 %v808_v1, %v3126_v43  ;;  %v2776_v19 = vpop.f32.mrb[0].mxu1  ;;  %v1379_v1 = vld [vmem:[%s3328_s24 + $0x8] sm:$0xff] }
 0x17d   : > { %v1348_v24 = vmax.f32 %v1316_v56, 0.0  ;;  %v1317_v30 = vadd.f32 %v3322_v44, %v1278_v57  ;;  %v1281_v35 = vmul.f32 %v2776_v19, %v3144_v60  ;;  %v870_v38 = vpop.f32.mrb[1].mxu1 }
 0x17e   : > { %v1346_v48 = vmax.f32 %v1314_v9, 0.0  ;;  %v1315_v55 = vadd.f32 %v3322_v44, %v1276_v13  ;;  %v1279_v33 = vmul.f32 %v870_v38, %v3136_v52  ;;  %v2777_v39 = vpop.f32.mrb[2].mxu1  ;;  %v1384_v9 = vld [vmem:[%s3328_s24 + $0x30] sm:$0xff] }
 0x17f   : > { %v1412_v50 = vmul.f32 %v1380_v3, %v1348_v24  ;;  %v1349_v7 = vmax.f32 %v1317_v30, 0.0  ;;  %v1320_v56 = vadd.f32 %v3322_v44, %v1281_v35  ;;  %v1282_v57 = vmul.f32 %v2777_v39, %v3142_v59  ;;  %v873_v10 = vpop.f32.mrb[3].mxu1 }
 0x180   : > { %v1410_v34 = vmul.f32 %v1378_v25, %v1346_v48  ;;  %v1347_v19 = vmax.f32 %v1315_v55, 0.0  ;;  %v1318_v49 = vadd.f32 %v3322_v44, %v1279_v33  ;;  %v1280_v13 = vmul.f32 %v873_v10, %v3134_v51  ;;  %v1383_v48 = vld [vmem:[%s3328_s24 + $0x28] sm:$0xff] }
 0x181   : > { %v1413_v6 = vmul.f32 %v1381_v12, %v1349_v7  ;;  %v1352_v38 = vmax.f32 %v1320_v56, 0.0  ;;  %v1321_v3 = vadd.f32 %v3322_v44, %v1282_v57 }
 0x182   : > { %v1411_v24 = vmul.f32 %v1379_v1, %v1347_v19  ;;  %v1350_v30 = vmax.f32 %v1318_v49, 0.0  ;;  %v1319_v35 = vadd.f32 %v3322_v44, %v1280_v13  ;;  %v1388_v19 = vld [vmem:[%s3328_s24 + $0x50] sm:$0xff] }
 0x183   : > { %v1443_v39 = vpack.c.bf16 %v1413_v6, %v1412_v50  ;;  %v1416_v11 = vmul.f32 %v1384_v9, %v1352_v38  ;;  %v1353_v25 = vmax.f32 %v1321_v3, 0.0  ;;  %v1386_v3 = vld [vmem:[%s3328_s24 + $0x40] sm:$0xff] }
 0x184   : > { %v1442_v55 = vpack.c.bf16 %v1411_v24, %v1410_v34  ;;  %v1414_v26 = vmul.f32 %v1382_v29, %v1350_v30  ;;  %v1351_v33 = vmax.f32 %v1319_v35, 0.0  ;;  %v2784_v10 = vpop.f32.mrb[4].mxu0 }
 0x185   : > { %v1417_v7 = vmul.f32 %v1385_v46, %v1353_v25  ;;  %v1285_v12 = vmul.f32 %v2784_v10, %v3176_v16  ;;  %v935_v56 = vpop.f32.mrb[5].mxu0 }
 0x186   : > { %v1415_v1 = vmul.f32 %v1383_v48, %v1351_v33  ;;  %v1283_v49 = vmul.f32 %v935_v56, %v3158_v5  ;;  %v2785_v57 = vpop.f32.mrb[6].mxu0  ;;  %2828 = vmatprep.mubr.msk.bf16.mxu0 %vm1466_vm1, %v1442_v55  ;;  %v1387_v55 = vld [vmem:[%s3328_s24 + $0x48] sm:$0xff] }
 0x187   : > { %v1445_v6 = vpack.c.bf16 %v1417_v7, %v1416_v11  ;;  %v1324_v50 = vadd.f32 %v3322_v44, %v1285_v12  ;;  %v1286_v29 = vmul.f32 %v2785_v57, %v3174_v14  ;;  %v938_v34 = vpop.f32.mrb[7].mxu0  ;;  %2829 = vmatmul.mubr.msk.bf16.vlgmr.msra.gmra.mrb[16].mxu0 %vm1466_vm1, %v1443_v39  ;;  %v1389_v11 = vld [vmem:[%s3328_s24 + $0x58] sm:$0xff] }
 0x188   : > { %v1444_v46 = vpack.c.bf16 %v1415_v1, %v1414_v26  ;;  %v1322_v9 = vadd.f32 %v3322_v44, %v1283_v49  ;;  %v1284_v13 = vmul.f32 %v938_v34, %v3156_v4 }
 0x189   : > { %v1356_v38 = vmax.f32 %v1324_v50, 0.0  ;;  %v1325_v24 = vadd.f32 %v3322_v44, %v1286_v29 }
 0x18a   : > { %v1354_v30 = vmax.f32 %v1322_v9, 0.0  ;;  %v1323_v35 = vadd.f32 %v3322_v44, %v1284_v13  ;;  %2832 = vmatprep.mubr.msk.bf16.mxu0 %vm1466_vm1, %v1444_v46 }
 0x18b   : > { %v1420_v25 = vmul.f32 %v1388_v19, %v1356_v38  ;;  %v1357_v48 = vmax.f32 %v1325_v24, 0.0  ;;  %v1392_v19 = vld [vmem:[%s3328_s24 + $0x70] sm:$0xff] }
 0x18c   : > { %v1418_v26 = vmul.f32 %v1386_v3, %v1354_v30  ;;  %v1355_v39 = vmax.f32 %v1323_v35, 0.0  ;;  %v2792_v33 = vpop.f32.mrb[4].mxu1  ;;  %v1390_v3 = vld [vmem:[%s3328_s24 + $0x60] sm:$0xff] }
 0x18d   : > { %v1421_v10 = vmul.f32 %v1389_v11, %v1357_v48  ;;  %v1289_v7 = vmul.f32 %v2792_v33, %v3202_v32  ;;  %v1000_v12 = vpop.f32.mrb[5].mxu1  ;;  %v1393_v11 = vld [vmem:[%s3328_s24 + $0x78] sm:$0xff] }
 0x18e   : > { %v1419_v56 = vmul.f32 %v1387_v55, %v1355_v39  ;;  %v1287_v1 = vmul.f32 %v1000_v12, %v3188_v23  ;;  %v2793_v49 = vpop.f32.mrb[6].mxu1  ;;  %v1391_v55 = vld [vmem:[%s3328_s24 + $0x68] sm:$0xff] }
 0x18f   : > { %v1447_v57 = vpack.c.bf16 %v1421_v10, %v1420_v25  ;;  %v1328_v50 = vadd.f32 %v3322_v44, %v1289_v7  ;;  %v1290_v29 = vmul.f32 %v2793_v49, %v3200_v31  ;;  %v1003_v34 = vpop.f32.mrb[7].mxu1  ;;  %2833 = vmatmul.mubr.msk.bf16.gmra.mrb[20].mxu0 %vm1466_vm1, %v1445_v6 }
 0x190   : > { %v1446_v46 = vpack.c.bf16 %v1419_v56, %v1418_v26  ;;  %v1326_v9 = vadd.f32 %v3322_v44, %v1287_v1  ;;  %v1288_v13 = vmul.f32 %v1003_v34, %v3186_v22 }
 0x191   : > { %v1360_v38 = vmax.f32 %v1328_v50, 0.0  ;;  %v1329_v24 = vadd.f32 %v3322_v44, %v1290_v29 }
 0x192   : > { %v1358_v30 = vmax.f32 %v1326_v9, 0.0  ;;  %v1327_v35 = vadd.f32 %v3322_v44, %v1288_v13  ;;  %2836 = vmatprep.mubr.msk.bf16.mxu0 %vm1466_vm1, %v1446_v46 }
 0x193   : > { %v1424_v25 = vmul.f32 %v1392_v19, %v1360_v38  ;;  %v1361_v48 = vmax.f32 %v1329_v24, 0.0  ;;  %v1396_v19 = vld [vmem:[%s3328_s24 + $0x90] sm:$0xff] }
 0x194   : > { %v1422_v6 = vmul.f32 %v1390_v3, %v1358_v30  ;;  %v1359_v26 = vmax.f32 %v1327_v35, 0.0  ;;  %v2800_v39 = vpop.f32.mrb[8].mxu0  ;;  %v1394_v3 = vld [vmem:[%s3328_s24 + $0x80] sm:$0xff] }
 0x195   : > { %v1425_v33 = vmul.f32 %v1393_v11, %v1361_v48  ;;  %v1293_v10 = vmul.f32 %v2800_v39, %v3228_v54  ;;  %v1065_v7 = vpop.f32.mrb[9].mxu0  ;;  %v1397_v11 = vld [vmem:[%s3328_s24 + $0x98] sm:$0xff] }
 0x196   : > { %v1423_v12 = vmul.f32 %v1391_v55, %v1359_v26  ;;  %v1291_v56 = vmul.f32 %v1065_v7, %v3214_v41  ;;  %v2801_v1 = vpop.f32.mrb[10].mxu0  ;;  %v1395_v55 = vld [vmem:[%s3328_s24 + $0x88] sm:$0xff] }
 0x197   : > { %v1449_v49 = vpack.c.bf16 %v1425_v33, %v1424_v25  ;;  %v1332_v50 = vadd.f32 %v3322_v44, %v1293_v10  ;;  %v1294_v29 = vmul.f32 %v2801_v1, %v3226_v53  ;;  %v1068_v34 = vpop.f32.mrb[11].mxu0  ;;  %2837 = vmatmul.mubr.msk.bf16.gmra.mrb[24].mxu0 %vm1466_vm1, %v1447_v57 }
 0x198   : > { %v1448_v46 = vpack.c.bf16 %v1423_v12, %v1422_v6  ;;  %v1330_v9 = vadd.f32 %v3322_v44, %v1291_v56  ;;  %v1292_v13 = vmul.f32 %v1068_v34, %v3212_v40 }
 0x199   : > { %v1364_v38 = vmax.f32 %v1332_v50, 0.0  ;;  %v1333_v24 = vadd.f32 %v3322_v44, %v1294_v29 }
 0x19a   : > { %v1362_v30 = vmax.f32 %v1330_v9, 0.0  ;;  %v1331_v35 = vadd.f32 %v3322_v44, %v1292_v13  ;;  %2840 = vmatprep.mubr.msk.bf16.mxu0 %vm1466_vm1, %v1448_v46 }
 0x19b   : > { %v1428_v25 = vmul.f32 %v1396_v19, %v1364_v38  ;;  %v1365_v48 = vmax.f32 %v1333_v24, 0.0  ;;  %v1400_v19 = vld [vmem:[%s3328_s24 + $0xb0] sm:$0xff] }
 0x19c   : > { %v1426_v57 = vmul.f32 %v1394_v3, %v1362_v30  ;;  %v1363_v6 = vmax.f32 %v1331_v35, 0.0  ;;  %v2808_v26 = vpop.f32.mrb[8].mxu1  ;;  %v1398_v3 = vld [vmem:[%s3328_s24 + $0xa0] sm:$0xff] }
 0x19d   : > { %v1429_v39 = vmul.f32 %v1397_v11, %v1365_v48  ;;  %v1297_v33 = vmul.f32 %v2808_v26, %v3254_v18  ;;  %v1130_v10 = vpop.f32.mrb[9].mxu1  ;;  %v1401_v11 = vld [vmem:[%s3328_s24 + $0xb8] sm:$0xff] }
 0x19e   : > { %v1427_v7 = vmul.f32 %v1395_v55, %v1363_v6  ;;  %v1295_v12 = vmul.f32 %v1130_v10, %v3240_v0  ;;  %v2809_v56 = vpop.f32.mrb[10].mxu1  ;;  %v1399_v55 = vld [vmem:[%s3328_s24 + $0xa8] sm:$0xff] }
 0x19f   : > { %v1451_v1 = vpack.c.bf16 %v1429_v39, %v1428_v25  ;;  %v1336_v50 = vadd.f32 %v3322_v44, %v1297_v33  ;;  %v1298_v29 = vmul.f32 %v2809_v56, %v3252_v17  ;;  %v1133_v34 = vpop.f32.mrb[11].mxu1  ;;  %2841 = vmatmul.mubr.msk.bf16.gmra.mrb[28].mxu0 %vm1466_vm1, %v1449_v49 }
 0x1a0   : > { %v1450_v46 = vpack.c.bf16 %v1427_v7, %v1426_v57  ;;  %v1334_v9 = vadd.f32 %v3322_v44, %v1295_v12  ;;  %v1296_v13 = vmul.f32 %v1133_v34, %v3238_v62 }
 0x1a1   : > { %v1368_v38 = vmax.f32 %v1336_v50, 0.0  ;;  %v1337_v24 = vadd.f32 %v3322_v44, %v1298_v29 }
 0x1a2   : > { %v1366_v30 = vmax.f32 %v1334_v9, 0.0  ;;  %v1335_v35 = vadd.f32 %v3322_v44, %v1296_v13  ;;  %2844 = vmatprep.mubr.msk.bf16.mxu0 %vm1466_vm1, %v1450_v46 }
 0x1a3   : > { %v1432_v25 = vmul.f32 %v1400_v19, %v1368_v38  ;;  %v1369_v48 = vmax.f32 %v1337_v24, 0.0  ;;  %v1404_v19 = vld [vmem:[%s3328_s24 + $0xd0] sm:$0xff] }
 0x1a4   : > { %v1430_v49 = vmul.f32 %v1398_v3, %v1366_v30  ;;  %v1367_v57 = vmax.f32 %v1335_v35, 0.0  ;;  %v2816_v6 = vpop.f32.mrb[12].mxu0  ;;  %v1402_v3 = vld [vmem:[%s3328_s24 + $0xc0] sm:$0xff] }
 0x1a5   : > { %v1433_v26 = vmul.f32 %v1401_v11, %v1369_v48  ;;  %v1301_v39 = vmul.f32 %v2816_v6, %v3280_v47  ;;  %v1195_v33 = vpop.f32.mrb[13].mxu0  ;;  %v1405_v11 = vld [vmem:[%s3328_s24 + $0xd8] sm:$0xff] }
 0x1a6   : > { %v1431_v10 = vmul.f32 %v1399_v55, %v1367_v57  ;;  %v1299_v7 = vmul.f32 %v1195_v33, %v3266_v28  ;;  %v2817_v12 = vpop.f32.mrb[14].mxu0  ;;  %v1403_v55 = vld [vmem:[%s3328_s24 + $0xc8] sm:$0xff] }
 0x1a7   : > { %v1453_v56 = vpack.c.bf16 %v1433_v26, %v1432_v25  ;;  %v1340_v50 = vadd.f32 %v3322_v44, %v1301_v39  ;;  %v1302_v29 = vmul.f32 %v2817_v12, %v3278_v45  ;;  %v1198_v34 = vpop.f32.mrb[15].mxu0  ;;  %2845 = vmatmul.mubr.msk.bf16.gmra.mrb[32].mxu0 %vm1466_vm1, %v1451_v1 }
 0x1a8   : > { %v1452_v46 = vpack.c.bf16 %v1431_v10, %v1430_v49  ;;  %v1338_v9 = vadd.f32 %v3322_v44, %v1299_v7  ;;  %v1300_v13 = vmul.f32 %v1198_v34, %v3264_v27 }
 0x1a9   : > { %v1372_v38 = vmax.f32 %v1340_v50, 0.0  ;;  %v1341_v24 = vadd.f32 %v3322_v44, %v1302_v29 }
 0x1aa   : > { %v1370_v30 = vmax.f32 %v1338_v9, 0.0  ;;  %v1339_v35 = vadd.f32 %v3322_v44, %v1300_v13  ;;  %2848 = vmatprep.mubr.msk.bf16.mxu0 %vm1466_vm1, %v1452_v46 }
 0x1ab   : > { %v1436_v25 = vmul.f32 %v1404_v19, %v1372_v38  ;;  %v1373_v48 = vmax.f32 %v1341_v24, 0.0  ;;  %v1408_v19 = vld [vmem:[%s3328_s24 + $0xf0] sm:$0xff] }
 0x1ac   : > { %v1434_v1 = vmul.f32 %v1402_v3, %v1370_v30  ;;  %v1371_v49 = vmax.f32 %v1339_v35, 0.0  ;;  %v2824_v57 = vpop.f32.mrb[12].mxu1  ;;  %v1406_v3 = vld [vmem:[%s3328_s24 + $0xe0] sm:$0xff] }
 0x1ad   : > { %v1437_v6 = vmul.f32 %v1405_v11, %v1373_v48  ;;  %v1305_v26 = vmul.f32 %v2824_v57, %v3303_v21  ;;  %v1260_v39 = vpop.f32.mrb[13].mxu1  ;;  %v1409_v11 = vld [vmem:[%s3328_s24 + $0xf8] sm:$0xff] }
 0x1ae   : > { %v1435_v33 = vmul.f32 %v1403_v55, %v1371_v49  ;;  %v1303_v10 = vmul.f32 %v1260_v39, %v3292_v61  ;;  %v2825_v7 = vpop.f32.mrb[14].mxu1  ;;  %v1407_v55 = vld [vmem:[%s3328_s24 + $0xe8] sm:$0xff] }
 0x1af   : > { %v1455_v12 = vpack.c.bf16 %v1437_v6, %v1436_v25  ;;  %v1344_v50 = vadd.f32 %v3322_v44, %v1305_v26  ;;  %v1306_v29 = vmul.f32 %v2825_v7, %v3301_v20  ;;  %v1263_v34 = vpop.f32.mrb[15].mxu1  ;;  %2849 = vmatmul.mubr.msk.bf16.gmra.mrb[36].mxu0 %vm1466_vm1, %v1453_v56 }
 0x1b0   : > { %v1454_v46 = vpack.c.bf16 %v1435_v33, %v1434_v1  ;;  %v1342_v9 = vadd.f32 %v3322_v44, %v1303_v10  ;;  %v1304_v13 = vmul.f32 %v1263_v34, %v3290_v58 }
 0x1b1   : > { %v1376_v38 = vmax.f32 %v1344_v50, 0.0  ;;  %v1345_v24 = vadd.f32 %v3322_v44, %v1306_v29 }
 0x1b2   : > { %v1374_v30 = vmax.f32 %v1342_v9, 0.0  ;;  %v1343_v35 = vadd.f32 %v3322_v44, %v1304_v13  ;;  %2852 = vmatprep.mubr.msk.bf16.mxu0 %vm1466_vm1, %v1454_v46 }
 0x1b3   : > { %v1440_v25 = vmul.f32 %v1408_v19, %v1376_v38  ;;  %v1377_v48 = vmax.f32 %v1345_v24, 0.0 }
 0x1b4   : > { %v1438_v56 = vmul.f32 %v1406_v3, %v1374_v30  ;;  %v1375_v1 = vmax.f32 %v1343_v35, 0.0 }
 0x1b5   : > { %v1441_v49 = vmul.f32 %v1409_v11, %v1377_v48 }
 0x1b6   : > { %v1439_v57 = vmul.f32 %v1407_v55, %v1375_v1 }
 0x1b7   : > { %v1457_v6 = vpack.c.bf16 %v1441_v49, %v1440_v25  ;;  %2853 = vmatmul.mubr.msk.bf16.gmra.mrb[40].mxu0 %vm1466_vm1, %v1455_v12 }
 0x1b8   : > { %v1456_v26 = vpack.c.bf16 %v1439_v57, %v1438_v56 }
 0x1ba   : > { %2856 = vmatprep.mubr.msk.bf16.mxu0 %vm1466_vm1, %v1456_v26 }
 0x1bf   : > { %2857 = vmatmul.mubr.msk.bf16.gmra.mrb[44].mxu0 %vm1466_vm1, %v1457_v6 }
 0x25a   : > { %v2830_v39 = vpop.f32.mrb[16].mxu0 }
 0x25b   : > { %v1549_v33 = vpop.f32.mrb[17].mxu0  ;;  %v1678_v10 = vmul.f32 %v2830_v39, %v3116_v36 }
 0x25c   : > { %v2831_v44 = vpop.f32.mrb[18].mxu0  ;;  %v1676_v29 = vmul.f32 %v1549_v33, %v3118_v37 }
 0x25d   : > { %v1679_v7 = vmul.f32 %v2831_v44, %v3124_v42  ;;  %v1552_v50 = vpop.f32.mrb[19].mxu0 }
 0x25e   : > { %v1677_v34 = vmul.f32 %v1552_v50, %v3126_v43 }
 0x25f   : > { %v1709_v46 = vpack.c.bf16 %v1679_v7, %v1678_v10 }
 0x260   : > { %v1708_v19 = vpack.c.bf16 %v1677_v34, %v1676_v29 }
 0x262   : > { %v2834_v12 = vpop.f32.mrb[20].mxu0  ;;  %2860 = vmatprep.subr.bf16.mxu1 %v1708_v19 }
 0x263   : > { %v1565_v9 = vpop.f32.mrb[21].mxu0  ;;  %2861 = vmatpush3.bf16.msra.mxu1 %v1708_v19  ;;  %v1682_v38 = vmul.f32 %v2834_v12, %v3144_v60  ;;  %v3701_v12 = vld [vmem:[#allocation6_spill] sm:$0xff] }
 0x264   : > { %v2835_v13 = vpop.f32.mrb[22].mxu0  ;;  %2862 = vmatprep.subr.bf16.mxu1 %v1709_v46  ;;  %v1680_v30 = vmul.f32 %v1565_v9, %v3136_v52  ;;  %v3702_v9 = vld [vmem:[#allocation5_spill] sm:$0xff] }
 0x265   : > { %v1683_v3 = vmul.f32 %v2835_v13, %v3142_v59  ;;  %v1568_v24 = vpop.f32.mrb[23].mxu0 }
 0x266   : > { %v1681_v11 = vmul.f32 %v1568_v24, %v3134_v51 }
 0x267   : > { %v1711_v35 = vpack.c.bf16 %v1683_v3, %v1682_v38  ;;  %2863 = vmatpush3.bf16.msra.mxu1 %v1709_v46 }
 0x268   : > { %v1710_v25 = vpack.c.bf16 %v1681_v11, %v1680_v30 }
 0x26a   : > { %v2838_v48 = vpop.f32.mrb[24].mxu0  ;;  %2865 = vmatmul.mubr.msk.bf16.vlgmr.msra.gmra.mrb[16].mxu1 %vm764_vm0, %v3149_v63  ;;  %2868 = vmatprep.subr.bf16.mxu1 %v1710_v25 }
 0x26b   : > { %v1581_v55 = vpop.f32.mrb[25].mxu0  ;;  %2869 = vmatpush3.bf16.msra.mxu1 %v1710_v25  ;;  %2872 = vmatprep.mubr.msk.bf16.mxu1 %vm764_vm0, %v3086_v15  ;;  %v1686_v1 = vmul.f32 %v2838_v48, %v3176_v16 }
 0x26c   : > { %v2839_v56 = vpop.f32.mrb[26].mxu0  ;;  %2870 = vmatprep.subr.bf16.mxu1 %v1711_v35  ;;  %v1684_v6 = vmul.f32 %v1581_v55, %v3158_v5  ;;  %v3703_v55 = vld [vmem:[#allocation8_spill] sm:$0xff] }
 0x26d   : > { %v1687_v49 = vmul.f32 %v2839_v56, %v3174_v14  ;;  %v1584_v57 = vpop.f32.mrb[27].mxu0 }
 0x26e   : > { %v1685_v26 = vmul.f32 %v1584_v57, %v3156_v4 }
 0x26f   : > { %v1713_v39 = vpack.c.bf16 %v1687_v49, %v1686_v1  ;;  %2871 = vmatpush3.bf16.msra.mxu1 %v1711_v35  ;;  %v3704_v1 = vld [vmem:[#allocation7_spill] sm:$0xff] }
 0x270   : > { %v1712_v63 = vpack.c.bf16 %v1685_v26, %v1684_v6 }
 0x272   : > { %v2842_v33 = vpop.f32.mrb[28].mxu0  ;;  %2873 = vmatmul.mubr.msk.bf16.vlgmr.msra.gmra.mrb[20].mxu1 %vm764_vm0, %v3165_v8  ;;  %2876 = vmatprep.subr.bf16.mxu1 %v1712_v63 }
 0x273   : > { %v1597_v15 = vpop.f32.mrb[29].mxu0  ;;  %2877 = vmatpush3.bf16.msra.mxu1 %v1712_v63  ;;  %2880 = vmatprep.mubr.msk.bf16.mxu1 %vm764_vm0, %v3154_v2  ;;  %v1690_v10 = vmul.f32 %v2842_v33, %v3202_v32 }
 0x274   : > { %v2843_v44 = vpop.f32.mrb[30].mxu0  ;;  %2878 = vmatprep.subr.bf16.mxu1 %v1713_v39  ;;  %v1688_v29 = vmul.f32 %v1597_v15, %v3188_v23 }
 0x275   : > { %v1691_v7 = vmul.f32 %v2843_v44, %v3200_v31  ;;  %v1600_v50 = vpop.f32.mrb[31].mxu0 }
 0x276   : > { %v1689_v34 = vmul.f32 %v1600_v50, %v3186_v22  ;;  %v3706_v50 = vld [vmem:[#allocation9_spill] sm:$0xff] }
 0x277   : > { %v1715_v46 = vpack.c.bf16 %v1691_v7, %v1690_v10  ;;  %2879 = vmatpush3.bf16.msra.mxu1 %v1713_v39  ;;  %v3705_v10 = vld [vmem:[#allocation10_spill] sm:$0xff] }
 0x278   : > { %v1714_v8 = vpack.c.bf16 %v1689_v34, %v1688_v29 }
 0x27a   : > { %v2846_v19 = vpop.f32.mrb[32].mxu0  ;;  %2881 = vmatmul.mubr.msk.bf16.vlgmr.msra.gmra.mrb[24].mxu1 %vm764_vm0, %v3701_v12  ;;  %2884 = vmatprep.subr.bf16.mxu1 %v1714_v8 }
 0x27b   : > { %v1613_v2 = vpop.f32.mrb[33].mxu0  ;;  %2885 = vmatpush3.bf16.msra.mxu1 %v1714_v8  ;;  %2888 = vmatprep.mubr.msk.bf16.mxu1 %vm764_vm0, %v3702_v9  ;;  %v1694_v38 = vmul.f32 %v2846_v19, %v3228_v54 }
 0x27c   : > { %v2847_v13 = vpop.f32.mrb[34].mxu0  ;;  %2886 = vmatprep.subr.bf16.mxu1 %v1715_v46  ;;  %v1692_v30 = vmul.f32 %v1613_v2, %v3214_v41 }
 0x27d   : > { %v1695_v3 = vmul.f32 %v2847_v13, %v3226_v53  ;;  %v1616_v24 = vpop.f32.mrb[35].mxu0 }
 0x27e   : > { %v1693_v11 = vmul.f32 %v1616_v24, %v3212_v40  ;;  %v3708_v24 = vld [vmem:[#allocation11_spill] sm:$0xff] }
 0x27f   : > { %v1717_v35 = vpack.c.bf16 %v1695_v3, %v1694_v38  ;;  %2887 = vmatpush3.bf16.msra.mxu1 %v1715_v46  ;;  %v3707_v38 = vld [vmem:[#allocation12_spill] sm:$0xff] }
 0x280   : > { %v1716_v25 = vpack.c.bf16 %v1693_v11, %v1692_v30 }
 0x282   : > { %v2850_v48 = vpop.f32.mrb[36].mxu0  ;;  %2889 = vmatmul.mubr.msk.bf16.vlgmr.msra.gmra.mrb[28].mxu1 %vm764_vm0, %v3703_v55  ;;  %2892 = vmatprep.subr.bf16.mxu1 %v1716_v25 }
 0x283   : > { %v1629_v56 = vpop.f32.mrb[37].mxu0  ;;  %2893 = vmatpush3.bf16.msra.mxu1 %v1716_v25  ;;  %2896 = vmatprep.mubr.msk.bf16.mxu1 %vm764_vm0, %v3704_v1  ;;  %v1698_v57 = vmul.f32 %v2850_v48, %v3254_v18 }
 0x284   : > { %v2851_v49 = vpop.f32.mrb[38].mxu0  ;;  %2894 = vmatprep.subr.bf16.mxu1 %v1717_v35  ;;  %v1696_v39 = vmul.f32 %v1629_v56, %v3240_v0 }
 0x285   : > { %v1699_v6 = vmul.f32 %v2851_v49, %v3252_v17  ;;  %v1632_v26 = vpop.f32.mrb[39].mxu0  ;;  %v3709_v49 = vld [vmem:[#allocation14_spill] sm:$0xff] }
 0x286   : > { %v1697_v63 = vmul.f32 %v1632_v26, %v3238_v62  ;;  %v2970_v26 = vmov 0.0  }
 0x287   : > { %v1719_v33 = vpack.c.bf16 %v1699_v6, %v1698_v57  ;;  %2895 = vmatpush3.bf16.msra.mxu1 %v1717_v35  ;;  %v3710_v57 = vld [vmem:[#allocation13_spill] sm:$0xff]  ;;  %v3711_v6 = vld [vmem:[#allocation15_spill] sm:$0xff]  ;;  %2924 = vmatprep.subr.bf16.mxu0 %v2970_v26 }
 0x288   : > { %v1718_v15 = vpack.c.bf16 %v1697_v63, %v1696_v39  ;;  %v2960_v39 = vld [vmem:[%s3674_s8] sm:$0xff]   ;;  %2926 = vmatprep.mubr.msk.bf16.mxu0 %vm2971_vm2, %v2970_v26  ;;  %v2219_v63 = vlaneseq }
 0x289   : > { %2925 = vmatpush3.bf16.msra.mxu0 %v2960_v39 }
 0x28a   : > { %v2854_v44 = vpop.f32.mrb[40].mxu0  ;;  %2897 = vmatmul.mubr.msk.bf16.vlgmr.msra.gmra.mrb[32].mxu1 %vm764_vm0, %v3705_v10  ;;  %2900 = vmatprep.subr.bf16.mxu1 %v1718_v15  ;;  %v3510_v10 = vld [vmem:[%s3673_s7] ss:$0 sm:$0xff] }
 0x28b   : > { %v1645_v7 = vpop.f32.mrb[41].mxu0  ;;  %2901 = vmatpush3.bf16.msra.mxu1 %v1718_v15  ;;  %2904 = vmatprep.mubr.msk.bf16.mxu1 %vm764_vm0, %v3706_v50  ;;  %v1702_v34 = vmul.f32 %v2854_v44, %v3280_v47  ;;  %v2225_v15 = vstv %s2224_s27 }
 0x28c   : > { %v2855_v29 = vpop.f32.mrb[42].mxu0  ;;  %2902 = vmatprep.subr.bf16.mxu1 %v1719_v33  ;;  %v1700_v19 = vmul.f32 %v1645_v7, %v3266_v28 }
 0x28d   : > { %v1703_v46 = vmul.f32 %v2855_v29, %v3278_v45  ;;  %v1648_v8 = vpop.f32.mrb[43].mxu0 }
 0x28e   : > { %v1701_v12 = vmul.f32 %v1648_v8, %v3264_v27 }
 0x28f   : > { %v1721_v2 = vpack.c.bf16 %v1703_v46, %v1702_v34  ;;  %2903 = vmatpush3.bf16.msra.mxu1 %v1719_v33  ;;  %v2220_v33 = vshrl.u32 %v2219_v63, 7 }
 0x290   : > { %v1720_v9 = vpack.c.bf16 %v1701_v12, %v1700_v19 }
 0x291   : > { %v2222_v7 = vadd.s32 16, %v2220_v33  ;;  %v2221_v50 = vadd.s32 8, %v2220_v33  ;;  %v2223_v46 = vadd.s32 24, %v2220_v33  ;;  %vm2226_vm3 = vcmp.eq.s32.totalorder %v2220_v33, %v2225_v15 }
 0x292   : > { %v2858_v13 = vpop.f32.mrb[44].mxu0  ;;  %2905 = vmatmul.mubr.msk.bf16.vlgmr.msra.gmra.mrb[36].mxu1 %vm764_vm0, %v3707_v38  ;;  %2908 = vmatprep.subr.bf16.mxu1 %v1720_v9 }
 0x293   : > { %v1661_v3 = vpop.f32.mrb[45].mxu0  ;;  %2909 = vmatpush3.bf16.msra.mxu1 %v1720_v9  ;;  %2912 = vmatprep.mubr.msk.bf16.mxu1 %vm764_vm0, %v3708_v24  ;;  %v1706_v11 = vmul.f32 %v2858_v13, %v3303_v21  ;;  %vm2228_vm4 = vcmp.eq.s32.totalorder %v2222_v7, %v2225_v15  ;;  %vm2227_vm5 = vcmp.eq.s32.totalorder %v2221_v50, %v2225_v15 }
 0x294   : > { %v2859_v30 = vpop.f32.mrb[46].mxu0  ;;  %2910 = vmatprep.subr.bf16.mxu1 %v1721_v2  ;;  %v1704_v48 = vmul.f32 %v1661_v3, %v3292_v61  ;;  %v3518_v3 = vsel %vm2226_vm3, 1.0, %v2970_v26  ;;  %vm2229_vm6 = vcmp.eq.s32.totalorder %v2223_v46, %v2225_v15 }
 0x295   : > { %v1707_v35 = vmul.f32 %v2859_v30, %v3301_v20  ;;  %v1664_v25 = vpop.f32.mrb[47].mxu0 }
 0x296   : > { %v1705_v55 = vmul.f32 %v1664_v25, %v3290_v58 }
 0x297   : > { %v1723_v56 = vpack.c.bf16 %v1707_v35, %v1706_v11  ;;  %2911 = vmatpush3.bf16.msra.mxu1 %v1721_v2  ;;  %v3522_v11 = vsel %vm2228_vm4, 1.0, %v2970_v26 }
 0x298   : > { %v1722_v1 = vpack.c.bf16 %v1705_v55, %v1704_v48  ;;  %v3527_v48 = vsel %vm2229_vm6, 1.0, %v2970_v26 }
 0x29a   : > { %2913 = vmatmul.mubr.msk.bf16.vlgmr.msra.gmra.mrb[40].mxu1 %vm764_vm0, %v3709_v49  ;;  %2916 = vmatprep.subr.bf16.mxu1 %v1722_v1 }
 0x29b   : > { %2917 = vmatpush3.bf16.msra.mxu1 %v1722_v1  ;;  %2920 = vmatprep.mubr.msk.bf16.mxu1 %vm764_vm0, %v3710_v57 }
 0x29c   : > { %2918 = vmatprep.subr.bf16.mxu1 %v1723_v56 }
 0x29f   : > { %2919 = vmatpush3.bf16.msra.mxu1 %v1723_v56 }
 0x2a2   : > { %2921 = vmatmul.mubr.msk.bf16.vlgmr.msra.gmra.mrb[44].mxu1 %vm764_vm0, %v3711_v6 }
 0x33d   : > { %v2866_v44 = vpop.f32.mrb[16].mxu1 }
 0x33e   : > { %v2118_v29 = vmul.f32 %v2866_v44, %v3116_v36  ;;  %v1758_v34 = vpop.f32.mrb[17].mxu1 }
 0x33f   : > { %v2116_v8 = vmul.f32 %v1758_v34, %v3118_v37  ;;  %v2867_v19 = vpop.f32.mrb[18].mxu1 }
 0x340   : > { %v2157_v12 = vadd.f32 %v3510_v10, %v2118_v29  ;;  %v2119_v2 = vmul.f32 %v2867_v19, %v3124_v42  ;;  %v1761_v9 = vpop.f32.mrb[19].mxu1  ;;  %v3524_v42 = vsel %vm2227_vm5, 1.0, %v2970_v26 }
 0x341   : > { %v2155_v13 = vadd.f32 %v3510_v10, %v2116_v8  ;;  %v2117_v38 = vmul.f32 %v1761_v9, %v3126_v43 }
 0x342   : > { %v2158_v36 = vadd.f32 %v3510_v10, %v2119_v2  ;;  %v2189_v24 = vmax.f32 %v2157_v12, 0.0 }
 0x343   : > { %v2187_v37 = vmax.f32 %v2155_v13, 0.0  ;;  %v2156_v30 = vadd.f32 %v3510_v10, %v2117_v38 }
 0x344   : > { %v2190_v35 = vmax.f32 %v2158_v36, 0.0  ;;  %v2240_v49 = vmul.f32 %v3522_v11, %v2189_v24 }
 0x345   : > { %v2238_v25 = vmul.f32 %v3518_v3, %v2187_v37  ;;  %v2188_v43 = vmax.f32 %v2156_v30, 0.0  ;;  %v2874_v55 = vpop.f32.mrb[20].mxu1 }
 0x346   : > { %v2122_v56 = vmul.f32 %v2874_v55, %v3144_v60  ;;  %v1807_v1 = vpop.f32.mrb[21].mxu1  ;;  %v2241_v63 = vmul.f32 %v3527_v48, %v2190_v35 }
 0x347   : > { %v2239_v57 = vmul.f32 %v3524_v42, %v2188_v43  ;;  %v2120_v6 = vmul.f32 %v1807_v1, %v3136_v52  ;;  %v2875_v39 = vpop.f32.mrb[22].mxu1  ;;  %v2270_v44 = vsel %vm1466_vm1, %v2238_v25, 0.0  ;;  %v2273_v52 = vsel %vm1466_vm1, %v2240_v49, 0.0 }
 0x348   : > { %v2161_v33 = vadd.f32 %v3510_v10, %v2122_v56  ;;  %v2123_v15 = vmul.f32 %v2875_v39, %v3142_v59  ;;  %v1810_v26 = vpop.f32.mrb[23].mxu1  ;;  %v2275_v2 = vsel %vm1466_vm1, %v2241_v63, 0.0 }
 0x349   : > { %v2271_v7 = vsel %vm1466_vm1, %v2239_v57, 0.0  ;;  %v2159_v60 = vadd.f32 %v3510_v10, %v2120_v6  ;;  %v2121_v50 = vmul.f32 %v1810_v26, %v3134_v51 }
 0x34a   : > { %v2272_v29 = vadd.f32 %v2271_v7, %v2270_v44  ;;  %v2162_v34 = vadd.f32 %v3510_v10, %v2123_v15  ;;  %v2193_v46 = vmax.f32 %v2161_v33, 0.0 }
 0x34b   : > { %v2191_v8 = vmax.f32 %v2159_v60, 0.0  ;;  %v2160_v19 = vadd.f32 %v3510_v10, %v2121_v50 }
 0x34c   : > { %v2274_v12 = vadd.f32 %v2273_v52, %v2272_v29  ;;  %v2194_v59 = vmax.f32 %v2162_v34, 0.0  ;;  %v2244_v37 = vmul.f32 %v3522_v11, %v2193_v46 }
 0x34d   : > { %v2242_v9 = vmul.f32 %v3518_v3, %v2191_v8  ;;  %v2192_v13 = vmax.f32 %v2160_v19, 0.0  ;;  %v2882_v38 = vpop.f32.mrb[24].mxu1 }
 0x34e   : > { %v2276_v36 = vadd.f32 %v2275_v2, %v2274_v12  ;;  %v2126_v51 = vmul.f32 %v2882_v38, %v3176_v16  ;;  %v1856_v24 = vpop.f32.mrb[25].mxu1  ;;  %v2245_v55 = vmul.f32 %v3527_v48, %v2194_v59  ;;  %v2286_v26 = vsel %vm1466_vm1, %v2244_v37, 0.0 }
 0x34f   : > { %v2243_v30 = vmul.f32 %v3524_v42, %v2192_v13  ;;  %v2124_v35 = vmul.f32 %v1856_v24, %v3158_v5  ;;  %v2883_v25 = vpop.f32.mrb[26].mxu1  ;;  %v2283_v57 = vsel %vm1466_vm1, %v2242_v9, 0.0 }
 0x350   : > { %v2277_v43 = vrot.slane %v2276_v36, 4  ;;  %v2165_v56 = vadd.f32 %v3510_v10, %v2126_v51  ;;  %v2127_v1 = vmul.f32 %v2883_v25, %v3174_v14  ;;  %v1859_v49 = vpop.f32.mrb[27].mxu1  ;;  %v2288_v29 = vsel %vm1466_vm1, %v2245_v55, 0.0 }
 0x351   : > { %v2284_v16 = vsel %vm1466_vm1, %v2243_v30, 0.0  ;;  %v2163_v6 = vadd.f32 %v3510_v10, %v2124_v35  ;;  %v2125_v39 = vmul.f32 %v1859_v49, %v3156_v4 }
 0x352   : > { %v2278_v63 = vadd.f32 %v2277_v43, %v2276_v36  ;;  %v2285_v33 = vadd.f32 %v2284_v16, %v2283_v57  ;;  %v2197_v5 = vmax.f32 %v2165_v56, 0.0  ;;  %v2166_v15 = vadd.f32 %v3510_v10, %v2127_v1 }
 0x353   : > { %v2195_v44 = vmax.f32 %v2163_v6, 0.0  ;;  %v2164_v7 = vadd.f32 %v3510_v10, %v2125_v39 }
 0x354   : > { %v2279_v14 = vrot.slane %v2278_v63, 2  ;;  %v2287_v60 = vadd.f32 %v2286_v26, %v2285_v33  ;;  %v2198_v50 = vmax.f32 %v2166_v15, 0.0  ;;  %v2248_v19 = vmul.f32 %v3522_v11, %v2197_v5 }
 0x355   : > { %v2246_v34 = vmul.f32 %v3518_v3, %v2195_v44  ;;  %v2196_v52 = vmax.f32 %v2164_v7, 0.0  ;;  %v2890_v46 = vpop.f32.mrb[28].mxu1 }
 0x356   : > { %v2280_v4 = vadd.f32 %v2279_v14, %v2278_v63  ;;  %v2289_v8 = vadd.f32 %v2288_v29, %v2287_v60  ;;  %v1905_v12 = vpop.f32.mrb[29].mxu1  ;;  %v2249_v59 = vmul.f32 %v3527_v48, %v2198_v50  ;;  %v2130_v9 = vmul.f32 %v2890_v46, %v3202_v32 }
 0x357   : > { %v2247_v2 = vmul.f32 %v3524_v42, %v2196_v52  ;;  %v2128_v13 = vmul.f32 %v1905_v12, %v3188_v23  ;;  %v2891_v38 = vpop.f32.mrb[30].mxu1  ;;  %v2296_v24 = vsel %vm1466_vm1, %v2246_v34, 0.0  ;;  %v2299_v49 = vsel %vm1466_vm1, %v2248_v19, 0.0 }
 0x358   : > { %v2281_v36 = vrot.slane %v2280_v4, 1  ;;  %v2290_v51 = vrot.slane %v2289_v8, 4  ;;  %v2131_v37 = vmul.f32 %v2891_v38, %v3200_v31  ;;  %v1908_v30 = vpop.f32.mrb[31].mxu1  ;;  %v2169_v25 = vadd.f32 %v3510_v10, %v2130_v9 }
 0x359   : > { %v2297_v35 = vsel %vm1466_vm1, %v2247_v2, 0.0  ;;  %v2167_v43 = vadd.f32 %v3510_v10, %v2128_v13  ;;  %v2129_v55 = vmul.f32 %v1908_v30, %v3186_v22  ;;  %v2301_v33 = vsel %vm1466_vm1, %v2249_v59, 0.0 }
 0x35a   : > { %v2282_v56 = vadd.f32 %v2281_v36, %v2280_v4  ;;  %v2291_v32 = vadd.f32 %v2290_v51, %v2289_v8  ;;  %v2298_v1 = vadd.f32 %v2297_v35, %v2296_v24  ;;  %v2170_v23 = vadd.f32 %v3510_v10, %v2131_v37 }
 0x35b   : > { %v2201_v57 = vmax.f32 %v2169_v25, 0.0  ;;  %v2199_v16 = vmax.f32 %v2167_v43, 0.0  ;;  %v2168_v31 = vadd.f32 %v3510_v10, %v2129_v55 }
 0x35c   : > { %v2292_v6 = vrot.slane %v2291_v32, 2  ;;  %v2300_v39 = vadd.f32 %v2299_v49, %v2298_v1  ;;  %v2202_v63 = vmax.f32 %v2170_v23, 0.0  ;;  %v2374_v26 = vpack.c.bf16 %v2282_v56, %v2282_v56 }
 0x35d   : > { %v2250_v5 = vmul.f32 %v3518_v3, %v2199_v16  ;;  %v2200_v15 = vmax.f32 %v2168_v31, 0.0  ;;  %v2898_v22 = vpop.f32.mrb[32].mxu1  ;;  %v2252_v60 = vmul.f32 %v3522_v11, %v2201_v57 }
 0x35e   : > { %v2293_v44 = vadd.f32 %v2292_v6, %v2291_v32  ;;  %v2302_v7 = vadd.f32 %v2301_v33, %v2300_v39  ;;  %v1954_v14 = vpop.f32.mrb[33].mxu1  ;;  %v2253_v50 = vmul.f32 %v3527_v48, %v2202_v63  ;;  %v2134_v34 = vmul.f32 %v2898_v22, %v3228_v54 }
 0x35f   : > { %v2251_v29 = vmul.f32 %v3524_v42, %v2200_v15  ;;  %v2899_v52 = vpop.f32.mrb[34].mxu1  ;;  %v2309_v8 = vsel %vm1466_vm1, %v2250_v5, 0.0  ;;  %v2132_v19 = vmul.f32 %v1954_v14, %v3214_v41  ;;  %v2312_v24 = vsel %vm1466_vm1, %v2252_v60, 0.0 }
 0x360   : > { %v2294_v46 = vrot.slane %v2293_v44, 1  ;;  %v2303_v4 = vrot.slane %v2302_v7, 4  ;;  %v1957_v12 = vpop.f32.mrb[35].mxu1  ;;  %v2173_v2 = vadd.f32 %v3510_v10, %v2134_v34  ;;  %v2135_v9 = vmul.f32 %v2899_v52, %v3226_v53 }
 0x361   : > { %v2310_v59 = vsel %vm1466_vm1, %v2251_v29, 0.0  ;;  %v2133_v13 = vmul.f32 %v1957_v12, %v3212_v40  ;;  %v2171_v54 = vadd.f32 %v3510_v10, %v2132_v19  ;;  %v2399_v56 = vunpack.c.l.b16 %v2374_v26 }
 0x362   : > { %v2295_v38 = vadd.f32 %v2294_v46, %v2293_v44  ;;  %v2304_v36 = vadd.f32 %v2303_v4, %v2302_v7  ;;  %v2311_v51 = vadd.f32 %v2310_v59, %v2309_v8  ;;  %v2205_v37 = vmax.f32 %v2173_v2, 0.0 }
 0x363   : > { %v2174_v30 = vadd.f32 %v3510_v10, %v2135_v9  ;;  %v2172_v41 = vadd.f32 %v3510_v10, %v2133_v13  ;;  %v2203_v55 = vmax.f32 %v2171_v54, 0.0  ;;  %v2314_v53 = vsel %vm1466_vm1, %v2253_v50, 0.0 }
 0x364   : > { %v2375_v35 = vpack.c.bf16 %v2295_v38, %v2295_v38  ;;  %v2305_v25 = vrot.slane %v2304_v36, 2  ;;  %v2313_v43 = vadd.f32 %v2312_v24, %v2311_v51  ;;  %v2256_v6 = vmul.f32 %v3522_v11, %v2205_v37 }
 0x365   : > { %v2206_v40 = vmax.f32 %v2174_v30, 0.0  ;;  %v2204_v32 = vmax.f32 %v2172_v41, 0.0  ;;  %v2906_v1 = vpop.f32.mrb[36].mxu1  ;;  %v2254_v16 = vmul.f32 %v3518_v3, %v2203_v55 }
 0x366   : > { %v2400_v23 = vunpack.c.l.b16 %v2375_v35  ;;  %v2306_v49 = vadd.f32 %v2305_v25, %v2304_v36  ;;  %v2315_v57 = vadd.f32 %v2314_v53, %v2313_v43  ;;  %v2003_v31 = vpop.f32.mrb[37].mxu1  ;;  %v2138_v63 = vmul.f32 %v2906_v1, %v3254_v18 }
 0x367   : > { %v2255_v39 = vmul.f32 %v3524_v42, %v2204_v32  ;;  %v2907_v33 = vpop.f32.mrb[38].mxu1  ;;  %v2257_v26 = vmul.f32 %v3527_v48, %v2206_v40  ;;  %v2322_v7 = vsel %vm1466_vm1, %v2254_v16, 0.0  ;;  %v2136_v50 = vmul.f32 %v2003_v31, %v3240_v0 }
 0x368   : > { %v2408_v5 = vsel %vm2407_vm7, %v2400_v23, %v2399_v56  ;;  %v2307_v15 = vrot.slane %v2306_v49, 1  ;;  %v2316_v22 = vrot.slane %v2315_v57, 4  ;;  %v2006_v44 = vpop.f32.mrb[39].mxu1  ;;  %v2177_v60 = vadd.f32 %v3510_v10, %v2138_v63 }
 0x369   : > { %v2323_v14 = vsel %vm1466_vm1, %v2255_v39, 0.0  ;;  %v2139_v18 = vmul.f32 %v2907_v33, %v3252_v17  ;;  %v2325_v46 = vsel %vm1466_vm1, %v2256_v6, 0.0  ;;  %v2175_v4 = vadd.f32 %v3510_v10, %v2136_v50 }
 0x36a   : > { %v2308_v29 = vadd.f32 %v2307_v15, %v2306_v49  ;;  %v2317_v34 = vadd.f32 %v2316_v22, %v2315_v57  ;;  %v2324_v52 = vadd.f32 %v2323_v14, %v2322_v7  ;;  %v2137_v8 = vmul.f32 %v2006_v44, %v3238_v62 }
 0x36b   : > { %v2178_v2 = vadd.f32 %v3510_v10, %v2139_v18  ;;  %v2327_v9 = vsel %vm1466_vm1, %v2257_v26, 0.0  ;;  %v2209_v0 = vmax.f32 %v2177_v60, 0.0  ;;  %v2207_v13 = vmax.f32 %v2175_v4, 0.0 }
 0x36c   : > { %v2376_v19 = vpack.c.bf16 %v2308_v29, %v2308_v29  ;;  %v2318_v12 = vrot.slane %v2317_v34, 2  ;;  %v2326_v59 = vadd.f32 %v2325_v46, %v2324_v52  ;;  %v2176_v38 = vadd.f32 %v3510_v10, %v2137_v8 }
 0x36d   : > { %v2914_v36 = vpop.f32.mrb[40].mxu1  ;;  %v2210_v24 = vmax.f32 %v2178_v2, 0.0  ;;  %v2258_v30 = vmul.f32 %v3518_v3, %v2207_v13  ;;  %v2260_v53 = vmul.f32 %v3522_v11, %v2209_v0 }
 0x36e   : > { %v2401_v17 = vunpack.c.l.b16 %v2376_v19  ;;  %v2319_v51 = vadd.f32 %v2318_v12, %v2317_v34  ;;  %v2328_v54 = vadd.f32 %v2327_v9, %v2326_v59  ;;  %v2052_v37 = vpop.f32.mrb[41].mxu1  ;;  %v2208_v62 = vmax.f32 %v2176_v38, 0.0 }
 0x36f   : > { %v2142_v41 = vmul.f32 %v2914_v36, %v3280_v47  ;;  %v2915_v35 = vpop.f32.mrb[42].mxu1  ;;  %v2140_v1 = vmul.f32 %v2052_v37, %v3266_v28  ;;  %v2261_v57 = vmul.f32 %v3527_v48, %v2210_v24  ;;  %v2335_v16 = vsel %vm1466_vm1, %v2258_v30, 0.0 }
 0x370   : > { %v2410_v25 = vsel %vm2409_vm8, %v2401_v17, %v2408_v5  ;;  %v2320_v43 = vrot.slane %v2319_v51, 1  ;;  %v2329_v55 = vrot.slane %v2328_v54, 4  ;;  %v2055_v56 = vpop.f32.mrb[43].mxu1  ;;  %v2259_v40 = vmul.f32 %v3524_v42, %v2208_v62 }
 0x371   : > { %v2181_v32 = vadd.f32 %v3510_v10, %v2142_v41  ;;  %v2143_v47 = vmul.f32 %v2915_v35, %v3278_v45  ;;  %v2179_v6 = vadd.f32 %v3510_v10, %v2140_v1  ;;  %v2141_v39 = vmul.f32 %v2055_v56, %v3264_v27 }
 0x372   : > { %v2321_v23 = vadd.f32 %v2320_v43, %v2319_v51  ;;  %v2330_v49 = vadd.f32 %v2329_v55, %v2328_v54  ;;  %v2336_v31 = vsel %vm1466_vm1, %v2259_v40, 0.0  ;;  %v2338_v28 = vsel %vm1466_vm1, %v2260_v53, 0.0 }
 0x373   : > { %v2337_v5 = vadd.f32 %v2336_v31, %v2335_v16  ;;  %v2182_v15 = vadd.f32 %v3510_v10, %v2143_v47  ;;  %v2213_v22 = vmax.f32 %v2181_v32, 0.0  ;;  %v2211_v26 = vmax.f32 %v2179_v6, 0.0 }
 0x374   : > { %v2377_v63 = vpack.c.bf16 %v2321_v23, %v2321_v23  ;;  %v2331_v33 = vrot.slane %v2330_v49, 2  ;;  %v2180_v44 = vadd.f32 %v3510_v10, %v2141_v39  ;;  %v2340_v34 = vsel %vm1466_vm1, %v2261_v57, 0.0 }
 0x375   : > { %v2922_v45 = vpop.f32.mrb[44].mxu1  ;;  %v2339_v60 = vadd.f32 %v2338_v28, %v2337_v5  ;;  %v2214_v50 = vmax.f32 %v2182_v15, 0.0  ;;  %v2262_v27 = vmul.f32 %v3518_v3, %v2211_v26  ;;  %v2264_v59 = vmul.f32 %v3522_v11, %v2213_v22 }
 0x376   : > { %v2402_v7 = vunpack.c.l.b16 %v2377_v63  ;;  %v2332_v14 = vadd.f32 %v2331_v33, %v2330_v49  ;;  %v2101_v29 = vpop.f32.mrb[45].mxu1  ;;  %v2212_v52 = vmax.f32 %v2180_v44, 0.0  ;;  %v2146_v18 = vmul.f32 %v2922_v45, %v3303_v21 }
 0x377   : > { %v2923_v46 = vpop.f32.mrb[46].mxu1  ;;  %v2341_v19 = vadd.f32 %v2340_v34, %v2339_v60  ;;  %v2144_v0 = vmul.f32 %v2101_v29, %v3292_v61  ;;  %v2265_v36 = vmul.f32 %v3527_v48, %v2214_v50  ;;  %v2348_v17 = vsel %vm1466_vm1, %v2262_v27, 0.0 }
 0x378   : > { %v2412_v4 = vsel %vm2411_vm9, %v2402_v7, %v2410_v25  ;;  %v2333_v8 = vrot.slane %v2332_v14, 1  ;;  %v2104_v12 = vpop.f32.mrb[47].mxu1  ;;  %v2263_v2 = vmul.f32 %v3524_v42, %v2212_v52  ;;  %v2185_v9 = vadd.f32 %v3510_v10, %v2146_v18 }
 0x379   : > { %v2342_v38 = vrot.slane %v2341_v19, 4  ;;  %v2147_v21 = vmul.f32 %v2923_v46, %v3301_v20  ;;  %v2183_v54 = vadd.f32 %v3510_v10, %v2144_v0  ;;  %v2145_v24 = vmul.f32 %v2104_v12, %v3290_v58 }
 0x37a   : > { %v2334_v13 = vadd.f32 %v2333_v8, %v2332_v14  ;;  %v2349_v51 = vsel %vm1466_vm1, %v2263_v2, 0.0  ;;  %v2351_v61 = vsel %vm1466_vm1, %v2264_v59, 0.0  ;;  %v2217_v35 = vmax.f32 %v2185_v9, 0.0  ;;  %v2668_v59 = vld [vmem:[%s3675_s9] ss:$0 sm:$0xff] }
 0x37b   : > { %v2343_v30 = vadd.f32 %v2342_v38, %v2341_v19  ;;  %v2350_v62 = vadd.f32 %v2349_v51, %v2348_v17  ;;  %v2186_v41 = vadd.f32 %v3510_v10, %v2147_v21  ;;  %v2215_v25 = vmax.f32 %v2183_v54, 0.0  ;;  %v2671_v38 = vld [vmem:[%s3676_s10] ss:$0 sm:$0xff] }
 0x37c   : > { %v2378_v37 = vpack.c.bf16 %v2334_v13, %v2334_v13  ;;  %v2184_v43 = vadd.f32 %v3510_v10, %v2145_v24  ;;  %v2353_v53 = vsel %vm1466_vm1, %v2265_v36, 0.0  ;;  %v2268_v57 = vmul.f32 %v3522_v11, %v2217_v35  ;;  %v2672_v54 = vld [vmem:[#allocation4] ss:$0 sm:$0xff] }
 0x37d   : > { %v2344_v55 = vrot.slane %v2343_v30, 2  ;;  %v2352_v56 = vadd.f32 %v2351_v61, %v2350_v62  ;;  %v2266_v40 = vmul.f32 %v3518_v3, %v2215_v25  ;;  %v2218_v32 = vmax.f32 %v2186_v41, 0.0 }
 0x37e   : > { %v2403_v20 = vunpack.c.l.b16 %v2378_v37  ;;  %v2216_v58 = vmax.f32 %v2184_v43, 0.0  ;;  %v2364_v5 = vsel %vm1466_vm1, %v2268_v57, 0.0 }
 0x37f   : > { %v2345_v23 = vadd.f32 %v2344_v55, %v2343_v30  ;;  %v2354_v49 = vadd.f32 %v2353_v53, %v2352_v56  ;;  %v2361_v10 = vsel %vm1466_vm1, %v2266_v40, 0.0  ;;  %v2269_v6 = vmul.f32 %v3527_v48, %v2218_v32 }
 0x380   : > { %v2414_v1 = vsel %vm2413_vm10, %v2403_v20, %v2412_v4  ;;  %v2267_v47 = vmul.f32 %v3524_v42, %v2216_v58 }
 0x381   : > { %v2346_v16 = vrot.slane %v2345_v23, 1  ;;  %v2355_v31 = vrot.slane %v2354_v49, 4  ;;  %v2366_v11 = vsel %vm1466_vm1, %v2269_v6, 0.0 }
 0x382   : > { %v2362_v39 = vsel %vm1466_vm1, %v2267_v47, 0.0 }
 0x383   : > { %v2347_v63 = vadd.f32 %v2346_v16, %v2345_v23  ;;  %v2356_v3 = vadd.f32 %v2355_v31, %v2354_v49  ;;  %v2363_v33 = vadd.f32 %v2362_v39, %v2361_v10 }
 0x385   : > { %v2379_v15 = vpack.c.bf16 %v2347_v63, %v2347_v63  ;;  %v2357_v28 = vrot.slane %v2356_v3, 2  ;;  %v2365_v22 = vadd.f32 %v2364_v5, %v2363_v33 }
 0x387   : > { %v2404_v42 = vunpack.c.l.b16 %v2379_v15  ;;  %v2358_v26 = vadd.f32 %v2357_v28, %v2356_v3  ;;  %v2367_v44 = vadd.f32 %v2366_v11, %v2365_v22 }
 0x389   : > { %v2359_v45 = vrot.slane %v2358_v26, 1  ;;  %v2368_v7 = vrot.slane %v2367_v44, 4  ;;  %v2416_v14 = vsel %vm2415_vm11, %v2404_v42, %v2414_v1 }
 0x38b   : > { %v2360_v48 = vadd.f32 %v2359_v45, %v2358_v26  ;;  %v2369_v60 = vadd.f32 %v2368_v7, %v2367_v44 }
 0x38d   : > { %v2380_v50 = vpack.c.bf16 %v2360_v48, %v2360_v48  ;;  %v2370_v29 = vrot.slane %v2369_v60, 2 }
 0x38f   : > { %v2405_v34 = vunpack.c.l.b16 %v2380_v50  ;;  %v2371_v27 = vadd.f32 %v2370_v29, %v2369_v60 }
 0x391   : > { %v2372_v52 = vrot.slane %v2371_v27, 1  ;;  %v2418_v18 = vsel %vm2417_vm12, %v2405_v34, %v2416_v14 }
 0x393   : > { %v2373_v46 = vadd.f32 %v2372_v52, %v2371_v27 }
 0x395   : > { %v2381_v4 = vpack.c.bf16 %v2373_v46, %v2373_v46 }
 0x397   : > { %v2406_v8 = vunpack.c.l.b16 %v2381_v4 }
 0x399   : > { %v2420_v19 = vsel %vm2419_vm13, %v2406_v8, %v2418_v18 }
 0x39a   : > { %v2421_v12 = vpack.c.b16 %v2420_v19, %v2420_v19 }
 0x39c   : > { %2927 = vmatmul.mubr.msk.bf16.vlgmr.msra.gmra.mrb[48].mxu0 %vm1466_vm1, %v2421_v12 }
 0x46f   : > { %v2465_v2 = vpop.f32.mrb[48].mxu0 }
 0x470   : > { %v2466_v9 = vadd.f32 %v2668_v59, %v2465_v2  ;;  %v2928_v0 = vpop.f32.mrb[49].mxu0 }
 0x471   : > { %v2468_v13 = vpop.f32.mrb[50].mxu0 }
 0x472   : > { %v2471_v36 = vmax.f32 %v2466_v9, 0.0  ;;  %v2929_v21 = vpop.f32.mrb[51].mxu0 }
 0x474   : > { %v2479_v17 = vmul.f32 %v2671_v38, %v2471_v36 }
 0x476   : > { %v2481_v51 = vsel %vm2480_vm14, %v2479_v17, 0.0 }
 0x477   : > { %2482 = vadd.xlane.f32.xlu0 %v2481_v51 }
 0x504   : > { %v2483_v24 = vpop.xlane.xlu0 %2482 }
 0x505   : > { %v2491_v37 = vadd.f32 %v2672_v54, %v2483_v24 }
 0x507   : > { %2493 = vst.msk [vmem:[%s448_s19] sm:$0xff] %vm2492_vm15, %v2491_v37 }
 0x508 PF: > { %s25_s25 = sadd.s32 1, %s2967_s25  }
 0x509   : > { %p22_p4 = scmp.ge.s32.totalorder %s25_s25, 6  }
 0x50b   :  { %24 = sbr.rel (!%p22_p4) target bundleno = 3 (0x3), region = 103 }

</bundles_post_ra>
